<compile_context>
chip_gen: v5e
topology: v5e:2x2
jax: 0.10.0
libtpu: 0.0.40
codegen_flags: <defaults>
</compile_context>

<pallas_src>
import math

import jax
import jax.numpy as jnp
from jax.experimental import pallas as pl
from jax.experimental.pallas import tpu as pltpu


def _lstm_classifier_kernel(x2d_ref,     # (T*B, F)     bf16, batch-padded, time-major flattened
                            wih0p_ref,   # (F, 8H)      bf16, layer-1 columns zero
                            bfull_ref,   # (1, 8H)      f32,  b0 (layer-0 cols) | b1 (layer-1 cols)
                            wbig_ref,    # (2H, 8H)     bf16, [[Whh0, Wih1], [0, Whh1]]
                            wlin_ref,    # (H, OUT_PAD) bf16
                            blin_ref,    # (1, OUT_PAD) f32, -1e30 on padded class lanes
                            logp_ref,    # (B, OUT_PAD) f32
                            h_out_ref,   # (2, B, H)    f32
                            c_out_ref):  # (2, B, H)    f32
    H8 = wbig_ref.shape[1]
    H = H8 // 8
    H2 = 2 * H
    H6 = 6 * H
    B = h_out_ref.shape[1]
    T = x2d_ref.shape[0] // B

    # hoisted, vreg-resident fused recurrent weight (read once)
    wbig = wbig_ref[...]

    # (2) all-timesteps input projection with BOTH layers' biases folded in;
    # one big matmul, off the serial critical path.
    gx = jnp.dot(x2d_ref[...], wih0p_ref[...],
                 preferred_element_type=jnp.float32) + bfull_ref[...]    # (T*B, 8H) f32

    def fused_step(gx_t, hcat, ccat):
        # (1) single MXU push: [h0, h1] @ [[Whh0, Wih1], [0, Whh1]]
        gates = gx_t + jnp.dot(hcat.astype(jnp.bfloat16), wbig,
                               preferred_element_type=jnp.float32)       # (B, 8H)
        # (3) packed gate columns [i0,i1,f0,f1,o0,o1 | g0,g1]:
        #     one sigmoid over 6H + one tanh over 2H, shared by both layers.
        sig = jax.nn.sigmoid(gates[:, :H6])
        gcat = jnp.tanh(gates[:, H6:])
        icat = sig[:, 0:H2]
        fcat = sig[:, H2:2 * H2]
        ocat = sig[:, 2 * H2:3 * H2]
        ccat_new = fcat * ccat + icat * gcat        # f32 cell state, both layers
        hcat_new = ocat * jnp.tanh(ccat_new)        # one tanh for both layers
        return hcat_new, ccat_new

    zeros2 = jnp.zeros((B, H2), jnp.float32)
    # lane mask keeping the layer-0 half of a (B, 2H) carry
    keep_l0 = (jax.lax.broadcasted_iota(jnp.int32, (1, H2), 1) < H
               ).astype(jnp.float32)

    # prologue: layer-0 step 0 (layer-1 half of the fused result is invalid -> mask it)
    hcat, ccat = fused_step(gx[0:B, :], zeros2, zeros2)
    hcat = hcat * keep_l0
    ccat = ccat * keep_l0

    # wavefront main loop: iteration t performs layer-0 step t AND layer-1 step t-1
    # in the one fused matmul above.  Fully unrolled (T static & small here).
    for t in range(1, T):
        hcat, ccat = fused_step(gx[t * B:(t + 1) * B, :], hcat, ccat)

    h_out_ref[0] = hcat[:, :H]          # h0_{T-1}
    c_out_ref[0] = ccat[:, :H]          # c0_{T-1}

    # epilogue: layer-1 step T-1 (the layer-0 half of this result is discarded)
    hcat, ccat = fused_step(gx[(T - 1) * B:T * B, :], hcat, ccat)
    h1 = hcat[:, H:]
    h_out_ref[1] = h1                   # h1_{T-1} == lstm_out[-1]
    c_out_ref[1] = ccat[:, H:]

    # classifier head: linear + log_softmax (padded classes carry -1e30 bias)
    logits = jnp.dot(h1.astype(jnp.bfloat16), wlin_ref[...],
                     preferred_element_type=jnp.float32) + blin_ref[...]
    m = jnp.max(logits, axis=1, keepdims=True)
    z = logits - m
    lse = jnp.log(jnp.sum(jnp.exp(z), axis=1, keepdims=True))
    logp_ref[...] = z - lse             # (6) lane-dense (B, OUT_PAD) store


def lstm_classifier_forward(x, params):
    """x: (T, B, input_dim) float32.  Returns (log_probs, (h_n, c_n))."""
    T, B, F = x.shape
    H = params["wbig"].shape[1] // 8
    out_pad = params["wlin"].shape[1]
    out_dim = params["out_dim"]

    # pad batch to a multiple of 8 sublanes; padded rows are sliced off at the end
    B_pad = max(8, ((B + 7) // 8) * 8)
    if B_pad != B:
        x = jnp.pad(x, ((0, 0), (0, B_pad - B), (0, 0)))
    # (4) bf16 MXU operands (also halves the x DMA footprint)
    x2d = x.reshape(T * B_pad, F).astype(jnp.bfloat16)

    vmem = pl.BlockSpec(memory_space=pltpu.MemorySpace.VMEM)

    log_probs, h_n, c_n = pl.pallas_call(
        _lstm_classifier_kernel,
        out_shape=(
            jax.ShapeDtypeStruct((B_pad, out_pad), jnp.float32),
            jax.ShapeDtypeStruct((2, B_pad, H), jnp.float32),
            jax.ShapeDtypeStruct((2, B_pad, H), jnp.float32),
        ),
        in_specs=[vmem] * 6,
        out_specs=(vmem, vmem, vmem),
    )(x2d, params["wih0p"], params["bfull"], params["wbig"],
      params["wlin"], params["blin"])

    # slice away batch / class padding
    return log_probs[:B, :out_dim], (h_n[:, :B], c_n[:, :B])


def init_params(key, input_dim, hidden_dim, output_dim):
    """PyTorch-style U(-1/sqrt(H), 1/sqrt(H)) init, pre-packed for the kernel."""
    H = hidden_dim
    k = 1.0 / math.sqrt(H)
    keys = jax.random.split(key, 10)

    def u(kk, shape):
        return jax.random.uniform(kk, shape, jnp.float32, minval=-k, maxval=k)

    # raw torch-layout weights (gate row order [i, f, g, o])
    wih0 = u(keys[0], (4 * H, input_dim))
    whh0 = u(keys[1], (4 * H, H))
    b0 = u(keys[2], (4 * H,)) + u(keys[3], (4 * H,))
    wih1 = u(keys[4], (4 * H, H))
    whh1 = u(keys[5], (4 * H, H))
    b1 = u(keys[6], (4 * H,)) + u(keys[7], (4 * H,))
    wlin = u(keys[8], (output_dim, H))
    blin = u(keys[9], (output_dim,))

    # split a (rows, 4H) torch-order [i,f,g,o] matrix into (i, f, o, g) blocks
    def gate_blocks(w_t):
        return (w_t[:, 0:H], w_t[:, H:2 * H], w_t[:, 3 * H:4 * H], w_t[:, 2 * H:3 * H])

    # pack two layers' gate blocks into the kernel column layout
    # [i0,i1,f0,f1,o0,o1,g0,g1]  (each block H wide)
    def pack_cols(l0, l1):
        i0, f0, o0, g0 = l0
        i1, f1, o1, g1 = l1
        return jnp.concatenate([i0, i1, f0, f1, o0, o1, g0, g1], axis=1)

    zF = jnp.zeros((input_dim, H), jnp.float32)
    zH = jnp.zeros((H, H), jnp.float32)

    # (F, 8H) input projection, zeros in all layer-1 columns
    wih0p = pack_cols(gate_blocks(wih0.T), (zF, zF, zF, zF))
    # combined per-step bias: layer-0 cols <- b0, layer-1 cols <- b1
    bfull = pack_cols(gate_blocks(b0.reshape(1, -1)), gate_blocks(b1.reshape(1, -1)))
    # fused recurrent weight [[Whh0, Wih1], [0, Whh1]] : (2H, 8H)
    wbig_top = pack_cols(gate_blocks(whh0.T), gate_blocks(wih1.T))
    wbig_bot = pack_cols((zH, zH, zH, zH), gate_blocks(whh1.T))
    wbig = jnp.concatenate([wbig_top, wbig_bot], axis=0)

    # classifier padded to the NEXT multiple of 128 lanes; padded-class bias = -1e30
    out_pad = ((output_dim + 127) // 128) * 128
    wlin_p = jnp.zeros((H, out_pad), jnp.float32).at[:, :output_dim].set(wlin.T)
    blin_p = jnp.full((1, out_pad), -1e30, jnp.float32).at[0, :output_dim].set(blin)

    return {
        "wih0p": wih0p.astype(jnp.bfloat16),
        "bfull": bfull,
        "wbig": wbig.astype(jnp.bfloat16),
        "wlin": wlin_p.astype(jnp.bfloat16),
        "blin": blin_p,
        "out_dim": output_dim,
        # raw f32 torch-layout weights for the pure-JAX reference
        "ref": {"wih0": wih0, "whh0": whh0, "b0": b0,
                "wih1": wih1, "whh1": whh1, "b1": b1,
                "wlin": wlin, "blin": blin},
    }


def _reference_forward(x, params):
    """Pure-JAX f32 reference mirroring torch semantics (correctness oracle)."""
    ref = params["ref"]
    H = ref["whh0"].shape[1]
    T, B, _ = x.shape

    def cell(x_t, h, c, wih, whh, b):
        g = x_t @ wih.T + h @ whh.T + b
        i = jax.nn.sigmoid(g[:, :H])
        f = jax.nn.sigmoid(g[:, H:2 * H])
        gg = jnp.tanh(g[:, 2 * H:3 * H])
        o = jax.nn.sigmoid(g[:, 3 * H:])
        c = f * c + i * gg
        return o * jnp.tanh(c), c

    h0 = c0 = h1 = c1 = jnp.zeros((B, H), jnp.float32)
    for t in range(T):
        h0, c0 = cell(x[t], h0, c0, ref["wih0"], ref["whh0"], ref["b0"])
        h1, c1 = cell(h0, h1, c1, ref["wih1"], ref["whh1"], ref["b1"])
    logits = h1 @ ref["wlin"].T + ref["blin"]
    return jax.nn.log_softmax(logits, axis=1), (jnp.stack([h0, h1]),
                                                jnp.stack([c0, c1]))


if __name__ == "__main__":
    SEQ, BATCH, INPUT_DIM, HIDDEN_DIM, OUTPUT_DIM = 8, 2, 16, 32, 8

    key = jax.random.PRNGKey(0)
    k_x, k_p = jax.random.split(key)
    x = jax.random.normal(k_x, (SEQ, BATCH, INPUT_DIM), jnp.float32)
    params = init_params(k_p, INPUT_DIM, HIDDEN_DIM, OUTPUT_DIM)

    log_probs, (h_n, c_n) = lstm_classifier_forward(x, params)
    jax.block_until_ready((log_probs, h_n, c_n))

    # sanity check against the pure-JAX f32 reference
    ref_lp, (ref_h, ref_c) = _reference_forward(x, params)
    assert log_probs.shape == (BATCH, OUTPUT_DIM)
    assert h_n.shape == (2, BATCH, HIDDEN_DIM) and c_n.shape == (2, BATCH, HIDDEN_DIM)
    # tolerance loosened vs the f32 reference because the kernel uses bf16 MXU operands
    assert jnp.allclose(log_probs, ref_lp, atol=3e-2, rtol=3e-2)
    assert jnp.allclose(h_n, ref_h, atol=3e-2, rtol=3e-2)
    assert jnp.allclose(c_n, ref_c, atol=3e-2, rtol=3e-2)

    print("KERNEL_OK")
</pallas_src>

<mosaic_0001>
module attributes {stable_mosaic.version = 11 : i64} {
  func.func @_lstm_classifier_kernel(%arg0: memref<64x16xbf16, #tpu.memory_space<vmem>>, %arg1: memref<16x256xbf16, #tpu.memory_space<vmem>>, %arg2: memref<1x256xf32, #tpu.memory_space<vmem>>, %arg3: memref<64x256xbf16, #tpu.memory_space<vmem>>, %arg4: memref<32x128xbf16, #tpu.memory_space<vmem>>, %arg5: memref<1x128xf32, #tpu.memory_space<vmem>>, %arg6: memref<8x128xf32, #tpu.memory_space<vmem>>, %arg7: memref<2x8x32xf32, #tpu.memory_space<vmem>>, %arg8: memref<2x8x32xf32, #tpu.memory_space<vmem>>) attributes {dimension_semantics = [], scalar_prefetch = 0 : i64, scratch_operands = 0 : i64, tpu.core_type = #tpu.core_type<tc>} {
    %c0 = arith.constant 0 : index
    %c0_0 = arith.constant 0 : index
    %0 = vector.load %arg3[%c0, %c0_0] : memref<64x256xbf16, #tpu.memory_space<vmem>>, vector<64x256xbf16>
    %c0_1 = arith.constant 0 : index
    %c0_2 = arith.constant 0 : index
    %1 = vector.load %arg0[%c0_1, %c0_2] : memref<64x16xbf16, #tpu.memory_space<vmem>>, vector<64x16xbf16>
    %c0_3 = arith.constant 0 : index
    %c0_4 = arith.constant 0 : index
    %2 = vector.load %arg1[%c0_3, %c0_4] : memref<16x256xbf16, #tpu.memory_space<vmem>>, vector<16x256xbf16>
    %cst = arith.constant dense<0.000000e+00> : vector<64x256xf32>
    %3 = tpu.matmul %1, %2, %cst {dimension_numbers = #tpu.dot_dimension_numbers<[1], [0], [0], [1], [0, 0, 1, 1], [], []>} : vector<64x16xbf16>, vector<16x256xbf16>, vector<64x256xf32> -> vector<64x256xf32>
    %c0_5 = arith.constant 0 : index
    %c0_6 = arith.constant 0 : index
    %4 = vector.load %arg2[%c0_5, %c0_6] : memref<1x256xf32, #tpu.memory_space<vmem>>, vector<1x256xf32>
    %5 = vector.broadcast %4 : vector<1x256xf32> to vector<64x256xf32>
    %6 = arith.addf %3, %5 : vector<64x256xf32>
    %cst_7 = arith.constant 0.000000e+00 : f32
    %7 = vector.broadcast %cst_7 : f32 to vector<8x64xf32>
    %8 = tpu.iota {dimensions = array<i32: 1>} : vector<1x64xi32>
    %c32_i32 = arith.constant 32 : i32
    %9 = vector.broadcast %c32_i32 : i32 to vector<1x64xi32>
    %10 = arith.cmpi slt, %8, %9 : vector<1x64xi32>
    %11 = arith.extui %10 : vector<1x64xi1> to vector<1x64xi32>
    %12 = arith.sitofp %11 : vector<1x64xi32> to vector<1x64xf32>
    %13 = vector.extract_strided_slice %6 {offsets = [0, 0], sizes = [8, 256], strides = [1, 1]} : vector<64x256xf32> to vector<8x256xf32>
    %14 = arith.truncf %7 : vector<8x64xf32> to vector<8x64xbf16>
    %cst_8 = arith.constant dense<0.000000e+00> : vector<8x256xf32>
    %15 = tpu.matmul %14, %0, %cst_8 {dimension_numbers = #tpu.dot_dimension_numbers<[1], [0], [0], [1], [0, 0, 1, 1], [], []>} : vector<8x64xbf16>, vector<64x256xbf16>, vector<8x256xf32> -> vector<8x256xf32>
    %16 = arith.addf %13, %15 : vector<8x256xf32>
    %17 = vector.extract_strided_slice %16 {offsets = [0, 0], sizes = [8, 192], strides = [1, 1]} : vector<8x256xf32> to vector<8x192xf32>
    %18 = arith.negf %17 : vector<8x192xf32>
    %19 = math.exp %18 : vector<8x192xf32>
    %cst_9 = arith.constant 1.000000e+00 : f32
    %20 = vector.broadcast %cst_9 : f32 to vector<8x192xf32>
    %21 = arith.addf %20, %19 : vector<8x192xf32>
    %22 = arith.divf %20, %21 : vector<8x192xf32>
    %23 = vector.extract_strided_slice %16 {offsets = [0, 192], sizes = [8, 64], strides = [1, 1]} : vector<8x256xf32> to vector<8x64xf32>
    %24 = math.tanh %23 : vector<8x64xf32>
    %25 = vector.extract_strided_slice %22 {offsets = [0, 0], sizes = [8, 64], strides = [1, 1]} : vector<8x192xf32> to vector<8x64xf32>
    %26 = vector.extract_strided_slice %22 {offsets = [0, 64], sizes = [8, 64], strides = [1, 1]} : vector<8x192xf32> to vector<8x64xf32>
    %27 = vector.extract_strided_slice %22 {offsets = [0, 128], sizes = [8, 64], strides = [1, 1]} : vector<8x192xf32> to vector<8x64xf32>
    %28 = arith.mulf %26, %7 : vector<8x64xf32>
    %29 = arith.mulf %25, %24 : vector<8x64xf32>
    %30 = arith.addf %28, %29 : vector<8x64xf32>
    %31 = math.tanh %30 : vector<8x64xf32>
    %32 = arith.mulf %27, %31 : vector<8x64xf32>
    %33 = vector.broadcast %12 : vector<1x64xf32> to vector<8x64xf32>
    %34 = arith.mulf %32, %33 : vector<8x64xf32>
    %35 = vector.broadcast %12 : vector<1x64xf32> to vector<8x64xf32>
    %36 = arith.mulf %30, %35 : vector<8x64xf32>
    %37 = vector.extract_strided_slice %6 {offsets = [8, 0], sizes = [8, 256], strides = [1, 1]} : vector<64x256xf32> to vector<8x256xf32>
    %38 = arith.truncf %34 : vector<8x64xf32> to vector<8x64xbf16>
    %cst_10 = arith.constant dense<0.000000e+00> : vector<8x256xf32>
    %39 = tpu.matmul %38, %0, %cst_10 {dimension_numbers = #tpu.dot_dimension_numbers<[1], [0], [0], [1], [0, 0, 1, 1], [], []>} : vector<8x64xbf16>, vector<64x256xbf16>, vector<8x256xf32> -> vector<8x256xf32>
    %40 = arith.addf %37, %39 : vector<8x256xf32>
    %41 = vector.extract_strided_slice %40 {offsets = [0, 0], sizes = [8, 192], strides = [1, 1]} : vector<8x256xf32> to vector<8x192xf32>
    %42 = arith.negf %41 : vector<8x192xf32>
    %43 = math.exp %42 : vector<8x192xf32>
    %cst_11 = arith.constant 1.000000e+00 : f32
    %44 = vector.broadcast %cst_11 : f32 to vector<8x192xf32>
    %45 = arith.addf %44, %43 : vector<8x192xf32>
    %46 = arith.divf %44, %45 : vector<8x192xf32>
    %47 = vector.extract_strided_slice %40 {offsets = [0, 192], sizes = [8, 64], strides = [1, 1]} : vector<8x256xf32> to vector<8x64xf32>
    %48 = math.tanh %47 : vector<8x64xf32>
    %49 = vector.extract_strided_slice %46 {offsets = [0, 0], sizes = [8, 64], strides = [1, 1]} : vector<8x192xf32> to vector<8x64xf32>
    %50 = vector.extract_strided_slice %46 {offsets = [0, 64], sizes = [8, 64], strides = [1, 1]} : vector<8x192xf32> to vector<8x64xf32>
    %51 = vector.extract_strided_slice %46 {offsets = [0, 128], sizes = [8, 64], strides = [1, 1]} : vector<8x192xf32> to vector<8x64xf32>
    %52 = arith.mulf %50, %36 : vector<8x64xf32>
    %53 = arith.mulf %49, %48 : vector<8x64xf32>
    %54 = arith.addf %52, %53 : vector<8x64xf32>
    %55 = math.tanh %54 : vector<8x64xf32>
    %56 = arith.mulf %51, %55 : vector<8x64xf32>
    %57 = vector.extract_strided_slice %6 {offsets = [16, 0], sizes = [8, 256], strides = [1, 1]} : vector<64x256xf32> to vector<8x256xf32>
    %58 = arith.truncf %56 : vector<8x64xf32> to vector<8x64xbf16>
    %cst_12 = arith.constant dense<0.000000e+00> : vector<8x256xf32>
    %59 = tpu.matmul %58, %0, %cst_12 {dimension_numbers = #tpu.dot_dimension_numbers<[1], [0], [0], [1], [0, 0, 1, 1], [], []>} : vector<8x64xbf16>, vector<64x256xbf16>, vector<8x256xf32> -> vector<8x256xf32>
    %60 = arith.addf %57, %59 : vector<8x256xf32>
    %61 = vector.extract_strided_slice %60 {offsets = [0, 0], sizes = [8, 192], strides = [1, 1]} : vector<8x256xf32> to vector<8x192xf32>
    %62 = arith.negf %61 : vector<8x192xf32>
    %63 = math.exp %62 : vector<8x192xf32>
    %cst_13 = arith.constant 1.000000e+00 : f32
    %64 = vector.broadcast %cst_13 : f32 to vector<8x192xf32>
    %65 = arith.addf %64, %63 : vector<8x192xf32>
    %66 = arith.divf %64, %65 : vector<8x192xf32>
    %67 = vector.extract_strided_slice %60 {offsets = [0, 192], sizes = [8, 64], strides = [1, 1]} : vector<8x256xf32> to vector<8x64xf32>
    %68 = math.tanh %67 : vector<8x64xf32>
    %69 = vector.extract_strided_slice %66 {offsets = [0, 0], sizes = [8, 64], strides = [1, 1]} : vector<8x192xf32> to vector<8x64xf32>
    %70 = vector.extract_strided_slice %66 {offsets = [0, 64], sizes = [8, 64], strides = [1, 1]} : vector<8x192xf32> to vector<8x64xf32>
    %71 = vector.extract_strided_slice %66 {offsets = [0, 128], sizes = [8, 64], strides = [1, 1]} : vector<8x192xf32> to vector<8x64xf32>
    %72 = arith.mulf %70, %54 : vector<8x64xf32>
    %73 = arith.mulf %69, %68 : vector<8x64xf32>
    %74 = arith.addf %72, %73 : vector<8x64xf32>
    %75 = math.tanh %74 : vector<8x64xf32>
    %76 = arith.mulf %71, %75 : vector<8x64xf32>
    %77 = vector.extract_strided_slice %6 {offsets = [24, 0], sizes = [8, 256], strides = [1, 1]} : vector<64x256xf32> to vector<8x256xf32>
    %78 = arith.truncf %76 : vector<8x64xf32> to vector<8x64xbf16>
    %cst_14 = arith.constant dense<0.000000e+00> : vector<8x256xf32>
    %79 = tpu.matmul %78, %0, %cst_14 {dimension_numbers = #tpu.dot_dimension_numbers<[1], [0], [0], [1], [0, 0, 1, 1], [], []>} : vector<8x64xbf16>, vector<64x256xbf16>, vector<8x256xf32> -> vector<8x256xf32>
    %80 = arith.addf %77, %79 : vector<8x256xf32>
    %81 = vector.extract_strided_slice %80 {offsets = [0, 0], sizes = [8, 192], strides = [1, 1]} : vector<8x256xf32> to vector<8x192xf32>
    %82 = arith.negf %81 : vector<8x192xf32>
    %83 = math.exp %82 : vector<8x192xf32>
    %cst_15 = arith.constant 1.000000e+00 : f32
    %84 = vector.broadcast %cst_15 : f32 to vector<8x192xf32>
    %85 = arith.addf %84, %83 : vector<8x192xf32>
    %86 = arith.divf %84, %85 : vector<8x192xf32>
    %87 = vector.extract_strided_slice %80 {offsets = [0, 192], sizes = [8, 64], strides = [1, 1]} : vector<8x256xf32> to vector<8x64xf32>
    %88 = math.tanh %87 : vector<8x64xf32>
    %89 = vector.extract_strided_slice %86 {offsets = [0, 0], sizes = [8, 64], strides = [1, 1]} : vector<8x192xf32> to vector<8x64xf32>
    %90 = vector.extract_strided_slice %86 {offsets = [0, 64], sizes = [8, 64], strides = [1, 1]} : vector<8x192xf32> to vector<8x64xf32>
    %91 = vector.extract_strided_slice %86 {offsets = [0, 128], sizes = [8, 64], strides = [1, 1]} : vector<8x192xf32> to vector<8x64xf32>
    %92 = arith.mulf %90, %74 : vector<8x64xf32>
    %93 = arith.mulf %89, %88 : vector<8x64xf32>
    %94 = arith.addf %92, %93 : vector<8x64xf32>
    %95 = math.tanh %94 : vector<8x64xf32>
    %96 = arith.mulf %91, %95 : vector<8x64xf32>
    %97 = vector.extract_strided_slice %6 {offsets = [32, 0], sizes = [8, 256], strides = [1, 1]} : vector<64x256xf32> to vector<8x256xf32>
    %98 = arith.truncf %96 : vector<8x64xf32> to vector<8x64xbf16>
    %cst_16 = arith.constant dense<0.000000e+00> : vector<8x256xf32>
    %99 = tpu.matmul %98, %0, %cst_16 {dimension_numbers = #tpu.dot_dimension_numbers<[1], [0], [0], [1], [0, 0, 1, 1], [], []>} : vector<8x64xbf16>, vector<64x256xbf16>, vector<8x256xf32> -> vector<8x256xf32>
    %100 = arith.addf %97, %99 : vector<8x256xf32>
    %101 = vector.extract_strided_slice %100 {offsets = [0, 0], sizes = [8, 192], strides = [1, 1]} : vector<8x256xf32> to vector<8x192xf32>
    %102 = arith.negf %101 : vector<8x192xf32>
    %103 = math.exp %102 : vector<8x192xf32>
    %cst_17 = arith.constant 1.000000e+00 : f32
    %104 = vector.broadcast %cst_17 : f32 to vector<8x192xf32>
    %105 = arith.addf %104, %103 : vector<8x192xf32>
    %106 = arith.divf %104, %105 : vector<8x192xf32>
    %107 = vector.extract_strided_slice %100 {offsets = [0, 192], sizes = [8, 64], strides = [1, 1]} : vector<8x256xf32> to vector<8x64xf32>
    %108 = math.tanh %107 : vector<8x64xf32>
    %109 = vector.extract_strided_slice %106 {offsets = [0, 0], sizes = [8, 64], strides = [1, 1]} : vector<8x192xf32> to vector<8x64xf32>
    %110 = vector.extract_strided_slice %106 {offsets = [0, 64], sizes = [8, 64], strides = [1, 1]} : vector<8x192xf32> to vector<8x64xf32>
    %111 = vector.extract_strided_slice %106 {offsets = [0, 128], sizes = [8, 64], strides = [1, 1]} : vector<8x192xf32> to vector<8x64xf32>
    %112 = arith.mulf %110, %94 : vector<8x64xf32>
    %113 = arith.mulf %109, %108 : vector<8x64xf32>
    %114 = arith.addf %112, %113 : vector<8x64xf32>
    %115 = math.tanh %114 : vector<8x64xf32>
    %116 = arith.mulf %111, %115 : vector<8x64xf32>
    %117 = vector.extract_strided_slice %6 {offsets = [40, 0], sizes = [8, 256], strides = [1, 1]} : vector<64x256xf32> to vector<8x256xf32>
    %118 = arith.truncf %116 : vector<8x64xf32> to vector<8x64xbf16>
    %cst_18 = arith.constant dense<0.000000e+00> : vector<8x256xf32>
    %119 = tpu.matmul %118, %0, %cst_18 {dimension_numbers = #tpu.dot_dimension_numbers<[1], [0], [0], [1], [0, 0, 1, 1], [], []>} : vector<8x64xbf16>, vector<64x256xbf16>, vector<8x256xf32> -> vector<8x256xf32>
    %120 = arith.addf %117, %119 : vector<8x256xf32>
    %121 = vector.extract_strided_slice %120 {offsets = [0, 0], sizes = [8, 192], strides = [1, 1]} : vector<8x256xf32> to vector<8x192xf32>
    %122 = arith.negf %121 : vector<8x192xf32>
    %123 = math.exp %122 : vector<8x192xf32>
    %cst_19 = arith.constant 1.000000e+00 : f32
    %124 = vector.broadcast %cst_19 : f32 to vector<8x192xf32>
    %125 = arith.addf %124, %123 : vector<8x192xf32>
    %126 = arith.divf %124, %125 : vector<8x192xf32>
    %127 = vector.extract_strided_slice %120 {offsets = [0, 192], sizes = [8, 64], strides = [1, 1]} : vector<8x256xf32> to vector<8x64xf32>
    %128 = math.tanh %127 : vector<8x64xf32>
    %129 = vector.extract_strided_slice %126 {offsets = [0, 0], sizes = [8, 64], strides = [1, 1]} : vector<8x192xf32> to vector<8x64xf32>
    %130 = vector.extract_strided_slice %126 {offsets = [0, 64], sizes = [8, 64], strides = [1, 1]} : vector<8x192xf32> to vector<8x64xf32>
    %131 = vector.extract_strided_slice %126 {offsets = [0, 128], sizes = [8, 64], strides = [1, 1]} : vector<8x192xf32> to vector<8x64xf32>
    %132 = arith.mulf %130, %114 : vector<8x64xf32>
    %133 = arith.mulf %129, %128 : vector<8x64xf32>
    %134 = arith.addf %132, %133 : vector<8x64xf32>
    %135 = math.tanh %134 : vector<8x64xf32>
    %136 = arith.mulf %131, %135 : vector<8x64xf32>
    %137 = vector.extract_strided_slice %6 {offsets = [48, 0], sizes = [8, 256], strides = [1, 1]} : vector<64x256xf32> to vector<8x256xf32>
    %138 = arith.truncf %136 : vector<8x64xf32> to vector<8x64xbf16>
    %cst_20 = arith.constant dense<0.000000e+00> : vector<8x256xf32>
    %139 = tpu.matmul %138, %0, %cst_20 {dimension_numbers = #tpu.dot_dimension_numbers<[1], [0], [0], [1], [0, 0, 1, 1], [], []>} : vector<8x64xbf16>, vector<64x256xbf16>, vector<8x256xf32> -> vector<8x256xf32>
    %140 = arith.addf %137, %139 : vector<8x256xf32>
    %141 = vector.extract_strided_slice %140 {offsets = [0, 0], sizes = [8, 192], strides = [1, 1]} : vector<8x256xf32> to vector<8x192xf32>
    %142 = arith.negf %141 : vector<8x192xf32>
    %143 = math.exp %142 : vector<8x192xf32>
    %cst_21 = arith.constant 1.000000e+00 : f32
    %144 = vector.broadcast %cst_21 : f32 to vector<8x192xf32>
    %145 = arith.addf %144, %143 : vector<8x192xf32>
    %146 = arith.divf %144, %145 : vector<8x192xf32>
    %147 = vector.extract_strided_slice %140 {offsets = [0, 192], sizes = [8, 64], strides = [1, 1]} : vector<8x256xf32> to vector<8x64xf32>
    %148 = math.tanh %147 : vector<8x64xf32>
    %149 = vector.extract_strided_slice %146 {offsets = [0, 0], sizes = [8, 64], strides = [1, 1]} : vector<8x192xf32> to vector<8x64xf32>
    %150 = vector.extract_strided_slice %146 {offsets = [0, 64], sizes = [8, 64], strides = [1, 1]} : vector<8x192xf32> to vector<8x64xf32>
    %151 = vector.extract_strided_slice %146 {offsets = [0, 128], sizes = [8, 64], strides = [1, 1]} : vector<8x192xf32> to vector<8x64xf32>
    %152 = arith.mulf %150, %134 : vector<8x64xf32>
    %153 = arith.mulf %149, %148 : vector<8x64xf32>
    %154 = arith.addf %152, %153 : vector<8x64xf32>
    %155 = math.tanh %154 : vector<8x64xf32>
    %156 = arith.mulf %151, %155 : vector<8x64xf32>
    %157 = vector.extract_strided_slice %6 {offsets = [56, 0], sizes = [8, 256], strides = [1, 1]} : vector<64x256xf32> to vector<8x256xf32>
    %158 = arith.truncf %156 : vector<8x64xf32> to vector<8x64xbf16>
    %cst_22 = arith.constant dense<0.000000e+00> : vector<8x256xf32>
    %159 = tpu.matmul %158, %0, %cst_22 {dimension_numbers = #tpu.dot_dimension_numbers<[1], [0], [0], [1], [0, 0, 1, 1], [], []>} : vector<8x64xbf16>, vector<64x256xbf16>, vector<8x256xf32> -> vector<8x256xf32>
    %160 = arith.addf %157, %159 : vector<8x256xf32>
    %161 = vector.extract_strided_slice %160 {offsets = [0, 0], sizes = [8, 192], strides = [1, 1]} : vector<8x256xf32> to vector<8x192xf32>
    %162 = arith.negf %161 : vector<8x192xf32>
    %163 = math.exp %162 : vector<8x192xf32>
    %cst_23 = arith.constant 1.000000e+00 : f32
    %164 = vector.broadcast %cst_23 : f32 to vector<8x192xf32>
    %165 = arith.addf %164, %163 : vector<8x192xf32>
    %166 = arith.divf %164, %165 : vector<8x192xf32>
    %167 = vector.extract_strided_slice %160 {offsets = [0, 192], sizes = [8, 64], strides = [1, 1]} : vector<8x256xf32> to vector<8x64xf32>
    %168 = math.tanh %167 : vector<8x64xf32>
    %169 = vector.extract_strided_slice %166 {offsets = [0, 0], sizes = [8, 64], strides = [1, 1]} : vector<8x192xf32> to vector<8x64xf32>
    %170 = vector.extract_strided_slice %166 {offsets = [0, 64], sizes = [8, 64], strides = [1, 1]} : vector<8x192xf32> to vector<8x64xf32>
    %171 = vector.extract_strided_slice %166 {offsets = [0, 128], sizes = [8, 64], strides = [1, 1]} : vector<8x192xf32> to vector<8x64xf32>
    %172 = arith.mulf %170, %154 : vector<8x64xf32>
    %173 = arith.mulf %169, %168 : vector<8x64xf32>
    %174 = arith.addf %172, %173 : vector<8x64xf32>
    %175 = math.tanh %174 : vector<8x64xf32>
    %176 = arith.mulf %171, %175 : vector<8x64xf32>
    %177 = vector.extract_strided_slice %176 {offsets = [0, 0], sizes = [8, 32], strides = [1, 1]} : vector<8x64xf32> to vector<8x32xf32>
    %c0_24 = arith.constant 0 : index
    %c0_25 = arith.constant 0 : index
    %c0_26 = arith.constant 0 : index
    %178 = vector.load %arg7[%c0_24, %c0_25, %c0_26] : memref<2x8x32xf32, #tpu.memory_space<vmem>>, vector<1x8x32xf32>
    %179 = vector.shape_cast %178 : vector<1x8x32xf32> to vector<8x32xf32>
    %180 = vector.shape_cast %177 : vector<8x32xf32> to vector<1x8x32xf32>
    tpu.vector_store %arg7[%c0_24, %c0_25, %c0_26], %180 {strides = array<i32>} : memref<2x8x32xf32, #tpu.memory_space<vmem>>, vector<1x8x32xf32>,
    %181 = vector.extract_strided_slice %174 {offsets = [0, 0], sizes = [8, 32], strides = [1, 1]} : vector<8x64xf32> to vector<8x32xf32>
    %c0_27 = arith.constant 0 : index
    %c0_28 = arith.constant 0 : index
    %c0_29 = arith.constant 0 : index
    %182 = vector.load %arg8[%c0_27, %c0_28, %c0_29] : memref<2x8x32xf32, #tpu.memory_space<vmem>>, vector<1x8x32xf32>
    %183 = vector.shape_cast %182 : vector<1x8x32xf32> to vector<8x32xf32>
    %184 = vector.shape_cast %181 : vector<8x32xf32> to vector<1x8x32xf32>
    tpu.vector_store %arg8[%c0_27, %c0_28, %c0_29], %184 {strides = array<i32>} : memref<2x8x32xf32, #tpu.memory_space<vmem>>, vector<1x8x32xf32>,
    %185 = vector.extract_strided_slice %6 {offsets = [56, 0], sizes = [8, 256], strides = [1, 1]} : vector<64x256xf32> to vector<8x256xf32>
    %186 = arith.truncf %176 : vector<8x64xf32> to vector<8x64xbf16>
    %cst_30 = arith.constant dense<0.000000e+00> : vector<8x256xf32>
    %187 = tpu.matmul %186, %0, %cst_30 {dimension_numbers = #tpu.dot_dimension_numbers<[1], [0], [0], [1], [0, 0, 1, 1], [], []>} : vector<8x64xbf16>, vector<64x256xbf16>, vector<8x256xf32> -> vector<8x256xf32>
    %188 = arith.addf %185, %187 : vector<8x256xf32>
    %189 = vector.extract_strided_slice %188 {offsets = [0, 0], sizes = [8, 192], strides = [1, 1]} : vector<8x256xf32> to vector<8x192xf32>
    %190 = arith.negf %189 : vector<8x192xf32>
    %191 = math.exp %190 : vector<8x192xf32>
    %cst_31 = arith.constant 1.000000e+00 : f32
    %192 = vector.broadcast %cst_31 : f32 to vector<8x192xf32>
    %193 = arith.addf %192, %191 : vector<8x192xf32>
    %194 = arith.divf %192, %193 : vector<8x192xf32>
    %195 = vector.extract_strided_slice %188 {offsets = [0, 192], sizes = [8, 64], strides = [1, 1]} : vector<8x256xf32> to vector<8x64xf32>
    %196 = math.tanh %195 : vector<8x64xf32>
    %197 = vector.extract_strided_slice %194 {offsets = [0, 0], sizes = [8, 64], strides = [1, 1]} : vector<8x192xf32> to vector<8x64xf32>
    %198 = vector.extract_strided_slice %194 {offsets = [0, 64], sizes = [8, 64], strides = [1, 1]} : vector<8x192xf32> to vector<8x64xf32>
    %199 = vector.extract_strided_slice %194 {offsets = [0, 128], sizes = [8, 64], strides = [1, 1]} : vector<8x192xf32> to vector<8x64xf32>
    %200 = arith.mulf %198, %174 : vector<8x64xf32>
    %201 = arith.mulf %197, %196 : vector<8x64xf32>
    %202 = arith.addf %200, %201 : vector<8x64xf32>
    %203 = math.tanh %202 : vector<8x64xf32>
    %204 = arith.mulf %199, %203 : vector<8x64xf32>
    %205 = vector.extract_strided_slice %204 {offsets = [0, 32], sizes = [8, 32], strides = [1, 1]} : vector<8x64xf32> to vector<8x32xf32>
    %c1 = arith.constant 1 : index
    %c0_32 = arith.constant 0 : index
    %c0_33 = arith.constant 0 : index
    %206 = vector.load %arg7[%c1, %c0_32, %c0_33] : memref<2x8x32xf32, #tpu.memory_space<vmem>>, vector<1x8x32xf32>
    %207 = vector.shape_cast %206 : vector<1x8x32xf32> to vector<8x32xf32>
    %208 = vector.shape_cast %205 : vector<8x32xf32> to vector<1x8x32xf32>
    tpu.vector_store %arg7[%c1, %c0_32, %c0_33], %208 {strides = array<i32>} : memref<2x8x32xf32, #tpu.memory_space<vmem>>, vector<1x8x32xf32>,
    %209 = vector.extract_strided_slice %202 {offsets = [0, 32], sizes = [8, 32], strides = [1, 1]} : vector<8x64xf32> to vector<8x32xf32>
    %c1_34 = arith.constant 1 : index
    %c0_35 = arith.constant 0 : index
    %c0_36 = arith.constant 0 : index
    %210 = vector.load %arg8[%c1_34, %c0_35, %c0_36] : memref<2x8x32xf32, #tpu.memory_space<vmem>>, vector<1x8x32xf32>
    %211 = vector.shape_cast %210 : vector<1x8x32xf32> to vector<8x32xf32>
    %212 = vector.shape_cast %209 : vector<8x32xf32> to vector<1x8x32xf32>
    tpu.vector_store %arg8[%c1_34, %c0_35, %c0_36], %212 {strides = array<i32>} : memref<2x8x32xf32, #tpu.memory_space<vmem>>, vector<1x8x32xf32>,
    %213 = arith.truncf %205 : vector<8x32xf32> to vector<8x32xbf16>
    %c0_37 = arith.constant 0 : index
    %c0_38 = arith.constant 0 : index
    %214 = vector.load %arg4[%c0_37, %c0_38] : memref<32x128xbf16, #tpu.memory_space<vmem>>, vector<32x128xbf16>
    %cst_39 = arith.constant dense<0.000000e+00> : vector<8x128xf32>
    %215 = tpu.matmul %213, %214, %cst_39 {dimension_numbers = #tpu.dot_dimension_numbers<[1], [0], [0], [1], [0, 0, 1, 1], [], []>} : vector<8x32xbf16>, vector<32x128xbf16>, vector<8x128xf32> -> vector<8x128xf32>
    %c0_40 = arith.constant 0 : index
    %c0_41 = arith.constant 0 : index
    %216 = vector.load %arg5[%c0_40, %c0_41] : memref<1x128xf32, #tpu.memory_space<vmem>>, vector<1x128xf32>
    %217 = vector.broadcast %216 : vector<1x128xf32> to vector<8x128xf32>
    %218 = arith.addf %215, %217 : vector<8x128xf32>
    %cst_42 = arith.constant dense<0xFF800000> : vector<8xf32>
    %219 = vector.multi_reduction <maximumf>, %218, %cst_42 [1] : vector<8x128xf32> to vector<8xf32>
    %220 = vector.shape_cast %219 : vector<8xf32> to vector<8x1xf32>
    %221 = vector.broadcast %220 : vector<8x1xf32> to vector<8x128xf32>
    %222 = arith.subf %218, %221 : vector<8x128xf32>
    %223 = math.exp %222 : vector<8x128xf32>
    %cst_43 = arith.constant dense<0.000000e+00> : vector<8xf32>
    %224 = vector.multi_reduction <add>, %223, %cst_43 [1] : vector<8x128xf32> to vector<8xf32>
    %225 = vector.shape_cast %224 : vector<8xf32> to vector<8x1xf32>
    %226 = math.log %225 : vector<8x1xf32>
    %227 = vector.broadcast %226 : vector<8x1xf32> to vector<8x128xf32>
    %228 = arith.subf %222, %227 : vector<8x128xf32>
    %c0_44 = arith.constant 0 : index
    %c0_45 = arith.constant 0 : index
    %229 = vector.load %arg6[%c0_44, %c0_45] : memref<8x128xf32, #tpu.memory_space<vmem>>, vector<8x128xf32>
    tpu.vector_store %arg6[%c0_44, %c0_45], %228 {strides = array<i32>} : memref<8x128xf32, #tpu.memory_space<vmem>>, vector<8x128xf32>,
    return
  }
}

</mosaic_0001>

<bundles_post_ra>
// kernel: tpu_custom_call.1
= control target key start
LH: loop header
LB: loop body
LE: loop exit
PB: predicated region body
PF: predicated region fallthrough
CT: control target
= control target key end

     0   :  { %14 = vsyncpa [#allocation3], 0  ;;  %s1811_s0 = inlined_call_operand.vmem [shape: bf16[64,16], index: 0, kind: input, shape index: {}]   ;;  %s1812_s1 = inlined_call_operand.vmem [shape: bf16[16,256], index: 1, kind: input, shape index: {}]   ;;  %s1813_s2 = inlined_call_operand.vmem [shape: f32[1,256], index: 2, kind: input, shape index: {}]   ;;  %s1814_s3 = inlined_call_operand.hbm [shape: bf16[64,256], index: 3, kind: input, shape index: {}]   ;;  %s1815_s4 = inlined_call_operand.vmem [shape: bf16[32,128], index: 4, kind: input, shape index: {}]   ;;  %s1816_s5 = inlined_call_operand.vmem [shape: f32[1,128], index: 5, kind: input, shape index: {}]   ;;  %s1817_s6 = inlined_call_operand.hbm [shape: f32[8,128], index: 6, kind: output, shape index: {0}]   ;;  %s1818_s7 = inlined_call_operand.hbm [shape: f32[2,8,32], index: 7, kind: output, shape index: {1}]   ;;  %s1819_s8 = inlined_call_operand.hbm [shape: f32[2,8,32], index: 8, kind: output, shape index: {2}]  }
   0x1   :  { %15 = vsyncpa [#allocation4], 0 }
   0x2   :  { %16 = vsyncpa [#allocation7], 0  ;;  %s27_s29 = sshll.u32 %s1814_s3, 4  ;;  %s1485_s30 = smov [#allocation2]   ;;  %s28_s29 = int_to_ptr.hbm [resolvable:$true] %s27_s29 }
   0x3   :  { %s29_s9 = sshll.u32 %s1485_s30, 4  ;;  %s1486_s10 = smov 128   ;;  %s30_s9 = int_to_ptr.vmem [resolvable:$true] %s29_s9 }
   0x4   :  { %s1487_s11 = smov 8  }
   0x5   :  { %35 = dma.hbm_to_vmem [thread:$0]  %s28_s29, 1024, %s30_s9, [#allocation3], %s1486_s10, %s1486_s10, %s1487_s11  }
   0x6   :  { %1479 = dma.done.wait [#allocation3], 1024  }
   0x7   :  { %1480 = vsyncadd [#allocation3], 4294966272  ;;  %v1249_v0 = vld [vmem:[#allocation2 + $0x34] sm:$0xf]  ;;  %v1196_v1 = vld [vmem:[#allocation2 + $0x38] sm:$0xf0]  ;;  %v170_v49 = vlaneseq }
   0x8   :  { %v1247_v2 = vld [vmem:[#allocation2 + $0x24] sm:$0xf]  ;;  %v1547_v3 = vor.u32 %v1249_v0, %v1196_v1  ;;  %v1188_v4 = vld [vmem:[#allocation2 + $0x28] sm:$0xf0]  ;;  %vm99_vm0 = vcmask 130048   ;;  %v1488_v31 = vmov 0  }
   0x9   :  { %v1255_v5 = vld [vmem:[%s1812_s1 + $0x4] sm:$0xf]  ;;  %v1155_v6 = vld [vmem:[%s1812_s1 + $0x8] sm:$0xf0]  ;;  %v1556_v8 = vor.u32 %v1247_v2, %v1188_v4  ;;  %v1194_v10 = vld [vmem:[#allocation2 + $0x30] sm:$0xf] }
   0xa   :  { %v1158_v7 = vor.u32 %v1255_v5, %v1155_v6  ;;  %236 = vmatpush.bf16.msra.mxu3 %v1547_v3  ;;  %v1251_v9 = vld [vmem:[%s1811_s0] sm:$0xff]  ;;  %v1245_v11 = vld [vmem:[#allocation2 + $0x14] sm:$0xf]  ;;  %v1180_v12 = vld [vmem:[#allocation2 + $0x18] sm:$0xf0]  ;;  %s1489_s22 = smov 64  }
   0xb   :  { %v1250_v13 = vld [vmem:[#allocation2 + $0x34] sm:$0xf0]  ;;  %v1186_v15 = vld [vmem:[#allocation2 + $0x20] sm:$0xf]  ;;  %v1248_v16 = vld [vmem:[#allocation2 + $0x24] sm:$0xf0]  ;;  %v1571_v19 = vor.u32 %v1245_v11, %v1180_v12 }
   0xc   :  { %148 = vmatpush.bf16.msra.mxu1 %v1158_v7  ;;  %v1561_v14 = vor.u32 %v1250_v13, %v1194_v10  ;;  %v1153_v17 = vld [vmem:[%s1812_s1] sm:$0xf]  ;;  %v1256_v18 = vld [vmem:[%s1812_s1 + $0x4] sm:$0xf0]  ;;  %v1243_v21 = vld [vmem:[#allocation2 + $0x4] sm:$0xf]  ;;  %v1575_v23 = vor.u32 %v1248_v16, %v1186_v15 }
   0xd   :  { %v1154_v20 = vor.u32 %v1256_v18, %v1153_v17  ;;  %v1172_v22 = vld [vmem:[#allocation2 + $0x8] sm:$0xf0]  ;;  %v1178_v24 = vld [vmem:[#allocation2 + $0x10] sm:$0xf]  ;;  %v1246_v25 = vld [vmem:[#allocation2 + $0x14] sm:$0xf0] }
   0xe   :  { %237 = vmatpush.bf16.msra.mxu3 %v1556_v8  ;;  %223 = vmatpush.bf16.msra.mxu2 %v1561_v14  ;;  %v1580_v26 = vor.u32 %v1243_v21, %v1172_v22  ;;  %v1583_v27 = vor.u32 %v1246_v25, %v1178_v24  ;;  %v1170_v28 = vld [vmem:[#allocation2] sm:$0xf]  ;;  %v1244_v29 = vld [vmem:[#allocation2 + $0x4] sm:$0xf0]  ;;  %v171_v50 = vand.u32 127, %v170_v49  ;;  %v1490_v51 = vmov 0.0  }
   0xf   :  { %1163 = vmatmul.msk.bf16.vlgmr.msra.gmra.mxu1 %vm99_vm0, %v1251_v9  ;;  %119 = vmatpush.bf16.msra.mxu0 %v1154_v20  ;;  %v1590_v30 = vor.u32 %v1244_v29, %v1170_v28  ;;  %v63_v32 = vld [vmem:[%s1813_s2] sm:$0x3]  ;;  %vm215_vm10 = vcmask 523264   ;;  %s1491_s9 = smov 96   ;;  %s1492_s12 = smov 32  }
  0x10   :  { %594 = vmatpush.bf16.msrb.mxu1 %v1547_v3  ;;  %v1623_v33 = vperm.slane %v63_v32, 1  ;;  %v1627_v42 = vperm.slane %v63_v32, 0  ;;  %vm172_vm1 = vcmp.lt.s32.totalorder %v171_v50, 32  ;;  %s1493_s13 = smov [#allocation6]   ;;  %s1100_s17 = sshll.u32 %s1818_s7, 4  ;;  %s1101_s17 = int_to_ptr.hbm [resolvable:$true] %s1100_s17 }
  0x11   :  { %v1167_v52 = vsel %vm172_vm1, 1.0, %v1490_v51  ;;  %s1098_s14 = sshll.u32 %s1493_s13, 4  ;;  %s1113_s1 = sshll.u32 %s1819_s8, 4  ;;  %s1099_s14 = int_to_ptr.vmem [resolvable:$true] %s1098_s14  ;;  %s1114_s1 = int_to_ptr.hbm [resolvable:$true] %s1113_s1 }
  0x12   :  { %238 = vmatpush.bf16.msra.mxu3 %v1571_v19  ;;  %224 = vmatpush.bf16.msra.mxu2 %v1575_v23  ;;  %s1495_s7 = smov [#allocation5]   ;;  %s1090_s23 = sshll.u32 %s1817_s6, 4  ;;  %s1091_s23 = int_to_ptr.hbm [resolvable:$true] %s1090_s23 }
  0x13   :  { %581 = vmatpush.bf16.msrb.mxu0 %v1561_v14  ;;  %305 = vrot.lane.b32.xlu2 %v1167_v52, %s1489_s22  ;;  %s1088_s21 = sshll.u32 %s1495_s7, 4  ;;  %s1089_s21 = int_to_ptr.vmem [resolvable:$true] %s1088_s21 }
  0x14   :  { %595 = vmatpush.bf16.msrb.mxu1 %v1556_v8  ;;  %1159 = vmatmul.msk.bf16.vlgmr.msra.gmra.mxu0 %vm99_vm0, %v1251_v9 }
  0x16   :  { %239 = vmatpush.bf16.msra.mxu3 %v1580_v26  ;;  %225 = vmatpush.bf16.msra.mxu2 %v1583_v27 }
  0x17   :  { %582 = vmatpush.bf16.msrb.mxu0 %v1575_v23 }
  0x18   :  { %596 = vmatpush.bf16.msrb.mxu1 %v1571_v19 }
  0x19   :  { %240 = vmatmul.bf16.vlgmr.msra.gmra.mxu3 %v1488_v31 }
  0x1a   :  { %330 = vmatpush.bf16.msrb.mxu3 %v1547_v3  ;;  %226 = vmatpush.bf16.msra.mxu2 %v1590_v30 }
  0x1b   :  { %583 = vmatpush.bf16.msrb.mxu0 %v1583_v27 }
  0x1c   :  { %597 = vmatpush.bf16.msrb.mxu1 %v1580_v26 }
  0x1d   :  { %227 = vmatmul.bf16.vlgmr.msra.gmra.mxu2 %v1488_v31 }
  0x1e   :  { %331 = vmatpush.bf16.msrb.mxu3 %v1556_v8  ;;  %317 = vmatpush.bf16.msrb.mxu2 %v1561_v14 }
  0x1f   :  { %584 = vmatpush.bf16.msrb.mxu0 %v1590_v30 }
  0x20   :  { %770 = vmatpush.bf16.msra.mxu1 %v1547_v3 }
  0x22   :  { %332 = vmatpush.bf16.msrb.mxu3 %v1571_v19  ;;  %318 = vmatpush.bf16.msrb.mxu2 %v1575_v23 }
  0x23   :  { %757 = vmatpush.bf16.msra.mxu0 %v1561_v14 }
  0x24   :  { %771 = vmatpush.bf16.msra.mxu1 %v1556_v8 }
  0x26   :  { %333 = vmatpush.bf16.msrb.mxu3 %v1580_v26  ;;  %319 = vmatpush.bf16.msrb.mxu2 %v1583_v27 }
  0x27   :  { %758 = vmatpush.bf16.msra.mxu0 %v1575_v23 }
  0x28   :  { %772 = vmatpush.bf16.msra.mxu1 %v1571_v19 }
  0x2a   :  { %418 = vmatpush.bf16.msra.mxu3 %v1547_v3  ;;  %320 = vmatpush.bf16.msrb.mxu2 %v1590_v30 }
  0x2b   :  { %759 = vmatpush.bf16.msra.mxu0 %v1583_v27 }
  0x2c   :  { %773 = vmatpush.bf16.msra.mxu1 %v1580_v26 }
  0x2e   :  { %419 = vmatpush.bf16.msra.mxu3 %v1556_v8  ;;  %405 = vmatpush.bf16.msra.mxu2 %v1561_v14 }
  0x2f   :  { %760 = vmatpush.bf16.msra.mxu0 %v1590_v30 }
  0x32   :  { %420 = vmatpush.bf16.msra.mxu3 %v1571_v19  ;;  %406 = vmatpush.bf16.msra.mxu2 %v1575_v23 }
  0x36   :  { %421 = vmatpush.bf16.msra.mxu3 %v1580_v26  ;;  %407 = vmatpush.bf16.msra.mxu2 %v1583_v27 }
  0x3a   :  { %408 = vmatpush.bf16.msra.mxu2 %v1590_v30 }
  0x8c   :  { %v150_v34 = vpop.f32.mrf.mxu1 }
  0x8d   :  { %v151_v35 = vadd.f32 %v150_v34, %v1623_v33 }
  0x91   :  { %v121_v43 = vpop.f32.mrf.mxu0 }
  0x92   :  { %v122_v44 = vadd.f32 %v121_v43, %v1627_v42 }
  0x94   :  { %v152_v29 = vpop.f32.mrf.mxu1 }
  0x95   :  { %v153_v31 = vadd.f32 %v152_v29, %v1623_v33 }
  0x9c   :  { %v241_v36 = vpop.f32.mrf.mxu3 }
  0x9d   :  { %v246_v37 = vadd.f32 %v241_v36, %v151_v35 }
  0x9f   :  { %1271 = vtanh.f32 %v246_v37  ;;  %v1201_v6 = vmul.f32 -1.442695, %v246_v37 }
  0xa0   :  { %v228_v38 = vpop.f32.mrf.mxu2 }
  0xa1   :  { %v245_v45 = vadd.f32 %v228_v38, %v122_v44 }
  0xa3   :  { %v1200_v46 = vmul.f32 -1.442695, %v245_v45 }
  0xa4   :  { %v243_v39 = vpop.f32.mrf.mxu3 }
  0xa5   :  { %v1272_v40 = vpop.eup %1271  ;;  %1273 = vpow2.f32 %v1200_v46  ;;  %v123_v39 = vpop.f32.mrf.mxu0 }
  0xa6   :  { %288 = vrot.lane.b32.xlu0 %v1272_v40, %s1489_s22  ;;  %v124_v40 = vadd.f32 %v123_v39, %v1627_v42 }
  0xa8   :  { %v230_v41 = vpop.f32.mrf.mxu2 }
  0xab   :  { %v1274_v47 = vpop.eup %1273 }
  0xac   :  { %v253_v48 = vadd.f32 1.0, %v1274_v47 }
  0xae   :  { %1275 = vrcp.f32 %v253_v48  ;;  %vm260_vm2 = vweird.f32 %v253_v48  ;;  %v266_v57 = vand.u32 2147483648, %v253_v48  ;;  %v264_v59 = vand.u32 2147483647, %v253_v48 }
  0xb0   :  { %v267_v60 = vor.u32 1.1754944e-38, %v266_v57  ;;  %vm265_vm5 = vcmp.eq.f32.partialorder %v264_v59, 8.507059e+37 }
  0xb4   :  { %v1276_v53 = vpop.eup %1275 }
  0xb5   :  { %v256_v54 = vmul.f32 %v1276_v53, %v253_v48  ;;  %vm261_vm3 = vweird.f32 %v1276_v53 }
  0xb6   :  { %vm262_vm4 = vmor %vm260_vm2, %vm261_vm3 }
  0xb7   :  { %v257_v55 = vsub.f32 1.0, %v256_v54 }
  0xb9   :  { %v258_v56 = vmul.f32 %v1276_v53, %v257_v55 }
  0xbb   :  { %v259_v58 = vadd.f32 %v1276_v53, %v258_v56 }
  0xbd   :  { %v263_v61 = vsel %vm262_vm4, %v1276_v53, %v259_v58  ;;  %v306_v58 = vpop.permute.xlu2 %305 }
  0xbe   :  { %v268_v62 = vsel %vm265_vm5, %v267_v60, %v263_v61 }
  0xbf   :  { %v286_v1 = vmul.f32 0.0, %v268_v62 }
 0x118   :  { %v289_v63 = vpop.permute.xlu0 %288 }
 0x119   :  { %v291_v0 = vmul.f32 %v289_v63, %v268_v62 }
 0x11b   :  { %293 = vrot.lane.b32.xlu0 %v291_v0, %s1489_s22 }
 0x18d   :  { %v294_v2 = vpop.permute.xlu0 %293 }
 0x18e   :  { %v1632_v4 = vadd.f32 %v294_v2, %v286_v1 }
 0x190   :  { %1277 = vtanh.f32 %v1632_v4  ;;  %v308_v59 = vmul.f32 %v306_v58, %v1632_v4 }
 0x191   :  { %1279 = vpow2.f32 %v1201_v6 }
 0x196   :  { %v1278_v5 = vpop.eup %1277 }
 0x197   :  { %299 = vrot.lane.b32.xlu1 %v1278_v5, %s1489_s22  ;;  %v1280_v7 = vpop.eup %1279  ;;  %v1252_v5 = vld [vmem:[%s1811_s0 + $0x8] sm:$0xff] }
 0x198   :  { %v254_v9 = vadd.f32 1.0, %v1280_v7  ;;  %1164 = vmatmul.msk.bf16.gmra.mxu1 %vm99_vm0, %v1252_v5  ;;  %1160 = vmatmul.msk.bf16.gmra.mxu0 %vm99_vm0, %v1252_v5 }
 0x19a   :  { %1281 = vrcp.f32 %v254_v9  ;;  %v281_v16 = vand.u32 2147483648, %v254_v9  ;;  %vm275_vm7 = vweird.f32 %v254_v9  ;;  %v279_v17 = vand.u32 2147483647, %v254_v9 }
 0x19c   :  { %v282_v20 = vor.u32 1.1754944e-38, %v281_v16  ;;  %vm280_vm9 = vcmp.eq.f32.partialorder %v279_v17, 8.507059e+37 }
 0x1a0   :  { %v1282_v10 = vpop.eup %1281 }
 0x1a1   :  { %v271_v11 = vmul.f32 %v1282_v10, %v254_v9  ;;  %vm276_vm6 = vweird.f32 %v1282_v10 }
 0x1a2   :  { %vm277_vm8 = vmor %vm275_vm7, %vm276_vm6 }
 0x1a3   :  { %v272_v12 = vsub.f32 1.0, %v271_v11 }
 0x1a5   :  { %v273_v13 = vmul.f32 %v1282_v10, %v272_v12 }
 0x1a7   :  { %v274_v15 = vadd.f32 %v1282_v10, %v273_v13 }
 0x1a9   :  { %v278_v18 = vsel %vm277_vm8, %v1282_v10, %v274_v15 }
 0x1aa   :  { %v283_v22 = vsel %vm280_vm9, %v282_v20, %v278_v18 }
 0x209   :  { %v300_v21 = vpop.permute.xlu1 %299 }
 0x20a   :  { %v302_v24 = vmul.f32 %v300_v21, %v283_v22 }
 0x20c   :  { %v303_v25 = vmul.f32 %v1167_v52, %v302_v24 }
 0x20e   :  { %v309_v28 = vpack.c.bf16 %v303_v25, %v303_v25 }
 0x210   :  { %1202 = vmatmul.msk.bf16.vlgmr.msrb.gmra.mxu2 %vm215_vm10, %v309_v28  ;;  %1203 = vmatmul.msk.bf16.vlgmr.msrb.gmra.mxu3 %vm215_vm10, %v309_v28 }
 0x211   :  { %506 = vmatpush.bf16.msrb.mxu3 %v1547_v3  ;;  %493 = vmatpush.bf16.msrb.mxu2 %v1561_v14 }
 0x215   :  { %507 = vmatpush.bf16.msrb.mxu3 %v1556_v8  ;;  %494 = vmatpush.bf16.msrb.mxu2 %v1575_v23  ;;  %v155_v21 = vpop.f32.mrf.mxu1 }
 0x216   :  { %v156_v22 = vadd.f32 %v155_v21, %v1623_v33 }
 0x219   :  { %508 = vmatpush.bf16.msrb.mxu3 %v1571_v19  ;;  %495 = vmatpush.bf16.msrb.mxu2 %v1583_v27 }
 0x21d   :  { %509 = vmatpush.bf16.msrb.mxu3 %v1580_v26  ;;  %496 = vmatpush.bf16.msrb.mxu2 %v1590_v30 }
 0x293   :  { %v322_v32 = vpop.f32.mrf.mxu2  ;;  %v335_v34 = vpop.f32.mrf.mxu3 }
 0x294   :  { %v340_v35 = vadd.f32 %v335_v34, %v153_v31  ;;  %v339_v41 = vadd.f32 %v322_v32, %v124_v40  ;;  %v126_v34 = vpop.f32.mrf.mxu0 }
 0x296   :  { %1283 = vtanh.f32 %v340_v35  ;;  %v1204_v43 = vmul.f32 -1.442695, %v339_v41  ;;  %v1205_v0 = vmul.f32 -1.442695, %v340_v35  ;;  %v127_v35 = vadd.f32 %v126_v34, %v1627_v42 }
 0x298   :  { %1285 = vpow2.f32 %v1204_v43 }
 0x29b   :  { %v324_v36 = vpop.f32.mrf.mxu2  ;;  %v337_v37 = vpop.f32.mrf.mxu3 }
 0x29c   :  { %v1284_v38 = vpop.eup %1283  ;;  %v128_v21 = vpop.f32.mrf.mxu0 }
 0x29d   :  { %382 = vrot.lane.b32.xlu1 %v1284_v38, %s1489_s22 }
 0x29e   :  { %v1286_v44 = vpop.eup %1285 }
 0x29f   :  { %v347_v45 = vadd.f32 1.0, %v1286_v44 }
 0x2a1   :  { %1287 = vrcp.f32 %v347_v45  ;;  %v360_v51 = vand.u32 2147483648, %v347_v45  ;;  %vm354_vm12 = vweird.f32 %v347_v45  ;;  %v358_v52 = vand.u32 2147483647, %v347_v45 }
 0x2a3   :  { %v361_v54 = vor.u32 1.1754944e-38, %v360_v51  ;;  %vm359_vm14 = vcmp.eq.f32.partialorder %v358_v52, 8.507059e+37 }
 0x2a7   :  { %v1288_v46 = vpop.eup %1287 }
 0x2a8   :  { %v350_v47 = vmul.f32 %v1288_v46, %v347_v45  ;;  %vm355_vm11 = vweird.f32 %v1288_v46 }
 0x2a9   :  { %vm356_vm13 = vmor %vm354_vm12, %vm355_vm11 }
 0x2aa   :  { %v351_v48 = vsub.f32 1.0, %v350_v47 }
 0x2ac   :  { %v352_v49 = vmul.f32 %v1288_v46, %v351_v48 }
 0x2ae   :  { %v353_v50 = vadd.f32 %v1288_v46, %v352_v49 }
 0x2b0   :  { %v357_v53 = vsel %vm356_vm13, %v1288_v46, %v353_v50 }
 0x2b1   :  { %v362_v55 = vsel %vm359_vm14, %v361_v54, %v357_v53 }
 0x2b2   :  { %v380_v60 = vmul.f32 %v362_v55, %v308_v59 }
 0x30f   :  { %v383_v56 = vpop.permute.xlu1 %382 }
 0x310   :  { %v385_v57 = vmul.f32 %v383_v56, %v362_v55 }
 0x312   :  { %387 = vrot.lane.b32.xlu2 %v385_v57, %s1489_s22 }
 0x36c   :  { %v388_v61 = vpop.permute.xlu2 %387 }
 0x36d   :  { %v1651_v62 = vadd.f32 %v388_v61, %v380_v60 }
 0x36f   :  { %1289 = vtanh.f32 %v1651_v62 }
 0x370   :  { %1291 = vpow2.f32 %v1205_v0 }
 0x375   :  { %v1290_v63 = vpop.eup %1289 }
 0x376   :  { %393 = vrot.lane.b32.xlu0 %v1290_v63, %s1489_s22  ;;  %v1292_v1 = vpop.eup %1291 }
 0x377   :  { %v348_v2 = vadd.f32 1.0, %v1292_v1 }
 0x379   :  { %1293 = vrcp.f32 %v348_v2  ;;  %v375_v11 = vand.u32 2147483648, %v348_v2  ;;  %vm369_vm1 = vweird.f32 %v348_v2  ;;  %v373_v12 = vand.u32 2147483647, %v348_v2 }
 0x37b   :  { %v376_v15 = vor.u32 1.1754944e-38, %v375_v11  ;;  %vm374_vm3 = vcmp.eq.f32.partialorder %v373_v12, 8.507059e+37  ;;  %v157_v11 = vpop.f32.mrf.mxu1 }
 0x37c   :  { %v158_v12 = vadd.f32 %v157_v11, %v1623_v33 }
 0x37f   :  { %v1294_v4 = vpop.eup %1293 }
 0x380   :  { %v365_v6 = vmul.f32 %v1294_v4, %v348_v2  ;;  %vm370_vm15 = vweird.f32 %v1294_v4 }
 0x381   :  { %vm371_vm2 = vmor %vm369_vm1, %vm370_vm15 }
 0x382   :  { %v366_v7 = vsub.f32 1.0, %v365_v6 }
 0x384   :  { %v367_v9 = vmul.f32 %v1294_v4, %v366_v7 }
 0x386   :  { %v368_v10 = vadd.f32 %v1294_v4, %v367_v9 }
 0x388   :  { %v372_v13 = vsel %vm371_vm2, %v1294_v4, %v368_v10 }
 0x389   :  { %v377_v17 = vsel %vm374_vm3, %v376_v15, %v372_v13 }
 0x3e8   :  { %v394_v16 = vpop.permute.xlu0 %393 }
 0x3e9   :  { %v396_v18 = vmul.f32 %v394_v16, %v377_v17 }
 0x3eb   :  { %v397_v20 = vpack.c.bf16 %v396_v18, %v396_v18 }
 0x3ed   :  { %1206 = vmatmul.msk.bf16.vlgmr.msra.gmra.mxu2 %vm215_vm10, %v397_v20  ;;  %1207 = vmatmul.msk.bf16.vlgmr.msra.gmra.mxu3 %vm215_vm10, %v397_v20 }
 0x3ee   :  { %682 = vmatpush.bf16.msra.mxu3 %v1547_v3  ;;  %669 = vmatpush.bf16.msra.mxu2 %v1561_v14 }
 0x3f2   :  { %683 = vmatpush.bf16.msra.mxu3 %v1556_v8  ;;  %670 = vmatpush.bf16.msra.mxu2 %v1575_v23 }
 0x3f6   :  { %684 = vmatpush.bf16.msra.mxu3 %v1571_v19  ;;  %671 = vmatpush.bf16.msra.mxu2 %v1583_v27 }
 0x3fa   :  { %685 = vmatpush.bf16.msra.mxu3 %v1580_v26  ;;  %672 = vmatpush.bf16.msra.mxu2 %v1590_v30 }
 0x470   :  { %v410_v24 = vpop.f32.mrf.mxu2  ;;  %v423_v25 = vpop.f32.mrf.mxu3 }
 0x471   :  { %v428_v28 = vadd.f32 %v423_v25, %v156_v22  ;;  %v427_v36 = vadd.f32 %v410_v24, %v127_v35  ;;  %v129_v22 = vadd.f32 %v128_v21, %v1627_v42 }
 0x473   :  { %1295 = vtanh.f32 %v428_v28  ;;  %v1208_v37 = vmul.f32 -1.442695, %v427_v36  ;;  %v1209_v57 = vmul.f32 -1.442695, %v428_v28 }
 0x475   :  { %1297 = vpow2.f32 %v1208_v37 }
 0x478   :  { %v412_v29 = vpop.f32.mrf.mxu2  ;;  %v425_v31 = vpop.f32.mrf.mxu3 }
 0x479   :  { %v1296_v32 = vpop.eup %1295 }
 0x47a   :  { %470 = vrot.lane.b32.xlu1 %v1296_v32, %s1489_s22 }
 0x47b   :  { %v1298_v38 = vpop.eup %1297 }
 0x47c   :  { %v435_v39 = vadd.f32 1.0, %v1298_v38 }
 0x47e   :  { %1299 = vrcp.f32 %v435_v39  ;;  %v448_v46 = vand.u32 2147483648, %v435_v39  ;;  %vm442_vm5 = vweird.f32 %v435_v39  ;;  %v446_v47 = vand.u32 2147483647, %v435_v39 }
 0x480   :  { %v449_v49 = vor.u32 1.1754944e-38, %v448_v46  ;;  %vm447_vm7 = vcmp.eq.f32.partialorder %v446_v47, 8.507059e+37  ;;  %v1254_v46 = vld [vmem:[%s1811_s0 + $0x18] sm:$0xff] }
 0x484   :  { %v1300_v40 = vpop.eup %1299 }
 0x485   :  { %v438_v41 = vmul.f32 %v1300_v40, %v435_v39  ;;  %vm443_vm4 = vweird.f32 %v1300_v40 }
 0x486   :  { %vm444_vm6 = vmor %vm442_vm5, %vm443_vm4 }
 0x487   :  { %v439_v43 = vsub.f32 1.0, %v438_v41 }
 0x489   :  { %v440_v44 = vmul.f32 %v1300_v40, %v439_v43 }
 0x48b   :  { %v441_v45 = vadd.f32 %v1300_v40, %v440_v44 }
 0x48d   :  { %v445_v48 = vsel %vm444_vm6, %v1300_v40, %v441_v45  ;;  %v1253_v45 = vld [vmem:[%s1811_s0 + $0x10] sm:$0xff] }
 0x48e   :  { %v450_v50 = vsel %vm447_vm7, %v449_v49, %v445_v48  ;;  %1165 = vmatmul.msk.bf16.gmra.mxu1 %vm99_vm0, %v1253_v45  ;;  %1161 = vmatmul.msk.bf16.gmra.mxu0 %vm99_vm0, %v1253_v45 }
 0x48f   :  { %v468_v53 = vmul.f32 %v450_v50, %v1651_v62 }
 0x49e   :  { %1166 = vmatmul.msk.bf16.gmra.mxu1 %vm99_vm0, %v1254_v46  ;;  %1162 = vmatmul.msk.bf16.gmra.mxu0 %vm99_vm0, %v1254_v46 }
 0x4ec   :  { %v471_v51 = vpop.permute.xlu1 %470 }
 0x4ed   :  { %v473_v52 = vmul.f32 %v471_v51, %v450_v50 }
 0x4ef   :  { %475 = vrot.lane.b32.xlu2 %v473_v52, %s1489_s22 }
 0x549   :  { %v476_v54 = vpop.permute.xlu2 %475 }
 0x54a   :  { %v1675_v55 = vadd.f32 %v476_v54, %v468_v53 }
 0x54c   :  { %1301 = vtanh.f32 %v1675_v55 }
 0x54d   :  { %1303 = vpow2.f32 %v1209_v57 }
 0x552   :  { %v1302_v56 = vpop.eup %1301 }
 0x553   :  { %481 = vrot.lane.b32.xlu0 %v1302_v56, %s1489_s22  ;;  %v1304_v58 = vpop.eup %1303 }
 0x554   :  { %v436_v59 = vadd.f32 1.0, %v1304_v58 }
 0x556   :  { %1305 = vrcp.f32 %v436_v59  ;;  %v463_v62 = vand.u32 2147483648, %v436_v59  ;;  %vm457_vm9 = vweird.f32 %v436_v59  ;;  %v461_v2 = vand.u32 2147483647, %v436_v59 }
 0x558   :  { %v464_v4 = vor.u32 1.1754944e-38, %v463_v62  ;;  %vm462_vm12 = vcmp.eq.f32.partialorder %v461_v2, 8.507059e+37 }
 0x55c   :  { %v1306_v60 = vpop.eup %1305 }
 0x55d   :  { %v453_v61 = vmul.f32 %v1306_v60, %v436_v59  ;;  %vm458_vm8 = vweird.f32 %v1306_v60 }
 0x55e   :  { %vm459_vm11 = vmor %vm457_vm9, %vm458_vm8 }
 0x55f   :  { %v454_v63 = vsub.f32 1.0, %v453_v61 }
 0x561   :  { %v455_v0 = vmul.f32 %v1306_v60, %v454_v63 }
 0x563   :  { %v456_v1 = vadd.f32 %v1306_v60, %v455_v0 }
 0x565   :  { %v460_v5 = vsel %vm459_vm11, %v1306_v60, %v456_v1 }
 0x566   :  { %v465_v7 = vsel %vm462_vm12, %v464_v4, %v460_v5  ;;  %v131_v5 = vpop.f32.mrf.mxu0  ;;  %v160_v4 = vpop.f32.mrf.mxu1 }
 0x5c5   :  { %v482_v6 = vpop.permute.xlu0 %481 }
 0x5c6   :  { %v484_v9 = vmul.f32 %v482_v6, %v465_v7  ;;  %v1718_v6 = vpop.f32.mrf.mxu0  ;;  %v1720_v7 = vpop.f32.mrf.mxu1 }
 0x5c8   :  { %v485_v10 = vpack.c.bf16 %v484_v9, %v484_v9 }
 0x5ca   :  { %1210 = vmatmul.msk.bf16.vlgmr.msrb.gmra.mxu2 %vm215_vm10, %v485_v10  ;;  %1211 = vmatmul.msk.bf16.vlgmr.msrb.gmra.mxu3 %vm215_vm10, %v485_v10 }
 0x5cb   :  { %858 = vmatpush.bf16.msrb.mxu3 %v1547_v3  ;;  %845 = vmatpush.bf16.msrb.mxu2 %v1561_v14 }
 0x5cf   :  { %859 = vmatpush.bf16.msrb.mxu3 %v1556_v8  ;;  %846 = vmatpush.bf16.msrb.mxu2 %v1575_v23 }
 0x5d3   :  { %860 = vmatpush.bf16.msrb.mxu3 %v1571_v19  ;;  %847 = vmatpush.bf16.msrb.mxu2 %v1583_v27 }
 0x5d7   :  { %861 = vmatpush.bf16.msrb.mxu3 %v1580_v26  ;;  %848 = vmatpush.bf16.msrb.mxu2 %v1590_v30 }
 0x64d   :  { %v498_v13 = vpop.f32.mrf.mxu2  ;;  %v511_v15 = vpop.f32.mrf.mxu3 }
 0x64e   :  { %v516_v16 = vadd.f32 %v511_v15, %v158_v12  ;;  %v515_v24 = vadd.f32 %v498_v13, %v129_v22 }
 0x650   :  { %1307 = vtanh.f32 %v516_v16  ;;  %v1212_v25 = vmul.f32 -1.442695, %v515_v24  ;;  %v1213_v51 = vmul.f32 -1.442695, %v516_v16 }
 0x652   :  { %1309 = vpow2.f32 %v1212_v25 }
 0x655   :  { %v500_v17 = vpop.f32.mrf.mxu2  ;;  %v513_v18 = vpop.f32.mrf.mxu3 }
 0x656   :  { %v1308_v20 = vpop.eup %1307 }
 0x657   :  { %558 = vrot.lane.b32.xlu1 %v1308_v20, %s1489_s22 }
 0x658   :  { %v1310_v28 = vpop.eup %1309 }
 0x659   :  { %v523_v29 = vadd.f32 1.0, %v1310_v28 }
 0x65b   :  { %1311 = vrcp.f32 %v523_v29  ;;  %v536_v37 = vand.u32 2147483648, %v523_v29  ;;  %vm530_vm14 = vweird.f32 %v523_v29  ;;  %v534_v38 = vand.u32 2147483647, %v523_v29 }
 0x65d   :  { %v537_v40 = vor.u32 1.1754944e-38, %v536_v37  ;;  %vm535_vm1 = vcmp.eq.f32.partialorder %v534_v38, 8.507059e+37 }
 0x661   :  { %v1312_v31 = vpop.eup %1311 }
 0x662   :  { %v526_v32 = vmul.f32 %v1312_v31, %v523_v29  ;;  %vm531_vm13 = vweird.f32 %v1312_v31 }
 0x663   :  { %vm532_vm15 = vmor %vm530_vm14, %vm531_vm13 }
 0x664   :  { %v527_v34 = vsub.f32 1.0, %v526_v32 }
 0x666   :  { %v528_v35 = vmul.f32 %v1312_v31, %v527_v34 }
 0x668   :  { %v529_v36 = vadd.f32 %v1312_v31, %v528_v35 }
 0x66a   :  { %v533_v39 = vsel %vm532_vm15, %v1312_v31, %v529_v36 }
 0x66b   :  { %v538_v41 = vsel %vm535_vm1, %v537_v40, %v533_v39 }
 0x66c   :  { %v556_v47 = vmul.f32 %v538_v41, %v1675_v55 }
 0x6c9   :  { %v559_v43 = vpop.permute.xlu1 %558 }
 0x6ca   :  { %v561_v44 = vmul.f32 %v559_v43, %v538_v41 }
 0x6cc   :  { %563 = vrot.lane.b32.xlu2 %v561_v44, %s1489_s22 }
 0x726   :  { %v564_v48 = vpop.permute.xlu2 %563 }
 0x727   :  { %v1704_v49 = vadd.f32 %v564_v48, %v556_v47 }
 0x729   :  { %1313 = vtanh.f32 %v1704_v49 }
 0x72a   :  { %1315 = vpow2.f32 %v1213_v51 }
 0x72f   :  { %v1314_v50 = vpop.eup %1313 }
 0x730   :  { %569 = vrot.lane.b32.xlu0 %v1314_v50, %s1489_s22  ;;  %v1316_v52 = vpop.eup %1315 }
 0x731   :  { %v524_v53 = vadd.f32 1.0, %v1316_v52 }
 0x733   :  { %1317 = vrcp.f32 %v524_v53  ;;  %v551_v55 = vand.u32 2147483648, %v524_v53  ;;  %vm545_vm2 = vweird.f32 %v524_v53  ;;  %v549_v60 = vand.u32 2147483647, %v524_v53 }
 0x735   :  { %v552_v63 = vor.u32 1.1754944e-38, %v551_v55  ;;  %vm550_vm4 = vcmp.eq.f32.partialorder %v549_v60, 8.507059e+37 }
 0x739   :  { %v1318_v54 = vpop.eup %1317 }
 0x73a   :  { %v541_v56 = vmul.f32 %v1318_v54, %v524_v53  ;;  %vm546_vm0 = vweird.f32 %v1318_v54 }
 0x73b   :  { %vm547_vm3 = vmor %vm545_vm2, %vm546_vm0 }
 0x73c   :  { %v542_v57 = vsub.f32 1.0, %v541_v56 }
 0x73e   :  { %v543_v58 = vmul.f32 %v1318_v54, %v542_v57 }
 0x740   :  { %v544_v59 = vadd.f32 %v1318_v54, %v543_v58  ;;  %v163_v58 = vadd.f32 %v1720_v7, %v1623_v33 }
 0x742   :  { %v548_v61 = vsel %vm547_vm3, %v1318_v54, %v544_v59  ;;  %v134_v59 = vadd.f32 %v1718_v6, %v1627_v42 }
 0x743   :  { %v553_v1 = vsel %vm550_vm4, %v552_v63, %v548_v61 }
 0x7a2   :  { %v570_v0 = vpop.permute.xlu0 %569 }
 0x7a3   :  { %v572_v62 = vmul.f32 %v570_v0, %v553_v1 }
 0x7a5   :  { %v573_v2 = vpack.c.bf16 %v572_v62, %v572_v62 }
 0x7a7   :  { %1214 = vmatmul.msk.bf16.vlgmr.msrb.gmra.mxu0 %vm215_vm10, %v573_v2  ;;  %1215 = vmatmul.msk.bf16.vlgmr.msrb.gmra.mxu1 %vm215_vm10, %v573_v2 }
 0x7a8   :  { %953 = vmatpush.bf16.msrb.mxu1 %v1547_v3  ;;  %940 = vmatpush.bf16.msrb.mxu0 %v1561_v14  ;;  %v1722_v3 = vpop.f32.mrf.mxu0  ;;  %v1724_v14 = vpop.f32.mrf.mxu1 }
 0x7ac   :  { %954 = vmatpush.bf16.msrb.mxu1 %v1556_v8  ;;  %941 = vmatpush.bf16.msrb.mxu0 %v1575_v23 }
 0x7b0   :  { %955 = vmatpush.bf16.msrb.mxu1 %v1571_v19  ;;  %942 = vmatpush.bf16.msrb.mxu0 %v1583_v27  ;;  %v1726_v8 = vpop.f32.mrf.mxu0  ;;  %v1728_v23 = vpop.f32.mrf.mxu1  ;;  %v132_v19 = vadd.f32 %v131_v5, %v1627_v42 }
 0x7b4   :  { %956 = vmatpush.bf16.msrb.mxu1 %v1580_v26  ;;  %943 = vmatpush.bf16.msrb.mxu0 %v1590_v30  ;;  %v161_v26 = vadd.f32 %v160_v4, %v1623_v33 }
 0x824   :  { %v586_v27 = vpop.f32.mrf.mxu0  ;;  %v599_v30 = vpop.f32.mrf.mxu1 }
 0x825   :  { %v603_v9 = vadd.f32 %v586_v27, %v132_v19  ;;  %v604_v10 = vadd.f32 %v599_v30, %v161_v26 }
 0x827   :  { %1319 = vtanh.f32 %v604_v10  ;;  %v1216_v15 = vmul.f32 -1.442695, %v603_v9  ;;  %v1217_v40 = vmul.f32 -1.442695, %v604_v10 }
 0x829   :  { %1321 = vpow2.f32 %v1216_v15 }
 0x82c   :  { %v588_v11 = vpop.f32.mrf.mxu0  ;;  %v601_v12 = vpop.f32.mrf.mxu1 }
 0x82d   :  { %v1320_v13 = vpop.eup %1319 }
 0x82e   :  { %646 = vrot.lane.b32.xlu1 %v1320_v13, %s1489_s22 }
 0x82f   :  { %v1322_v16 = vpop.eup %1321 }
 0x830   :  { %v611_v17 = vadd.f32 1.0, %v1322_v16 }
 0x832   :  { %1323 = vrcp.f32 %v611_v17  ;;  %v624_v25 = vand.u32 2147483648, %v611_v17  ;;  %vm618_vm6 = vweird.f32 %v611_v17  ;;  %v622_v28 = vand.u32 2147483647, %v611_v17 }
 0x834   :  { %v625_v31 = vor.u32 1.1754944e-38, %v624_v25  ;;  %vm623_vm8 = vcmp.eq.f32.partialorder %v622_v28, 8.507059e+37 }
 0x838   :  { %v1324_v18 = vpop.eup %1323 }
 0x839   :  { %v614_v20 = vmul.f32 %v1324_v18, %v611_v17  ;;  %vm619_vm5 = vweird.f32 %v1324_v18 }
 0x83a   :  { %vm620_vm7 = vmor %vm618_vm6, %vm619_vm5 }
 0x83b   :  { %v615_v21 = vsub.f32 1.0, %v614_v20 }
 0x83d   :  { %v616_v22 = vmul.f32 %v1324_v18, %v615_v21 }
 0x83f   :  { %v617_v24 = vadd.f32 %v1324_v18, %v616_v22 }
 0x841   :  { %v621_v29 = vsel %vm620_vm7, %v1324_v18, %v617_v24 }
 0x842   :  { %v626_v34 = vsel %vm623_vm8, %v625_v31, %v621_v29 }
 0x843   :  { %v644_v36 = vmul.f32 %v626_v34, %v1704_v49 }
 0x8a0   :  { %v647_v32 = vpop.permute.xlu1 %646 }
 0x8a1   :  { %v649_v35 = vmul.f32 %v647_v32, %v626_v34 }
 0x8a3   :  { %651 = vrot.lane.b32.xlu2 %v649_v35, %s1489_s22 }
 0x8fd   :  { %v652_v37 = vpop.permute.xlu2 %651 }
 0x8fe   :  { %v654_v38 = vadd.f32 %v652_v37, %v644_v36 }
 0x900   :  { %1325 = vtanh.f32 %v654_v38 }
 0x901   :  { %1327 = vpow2.f32 %v1217_v40 }
 0x906   :  { %v1326_v39 = vpop.eup %1325 }
 0x907   :  { %657 = vrot.lane.b32.xlu0 %v1326_v39, %s1489_s22  ;;  %v1328_v41 = vpop.eup %1327 }
 0x908   :  { %v612_v43 = vadd.f32 1.0, %v1328_v41 }
 0x90a   :  { %1329 = vrcp.f32 %v612_v43  ;;  %v639_v50 = vand.u32 2147483648, %v612_v43  ;;  %vm633_vm11 = vweird.f32 %v612_v43  ;;  %v637_v49 = vand.u32 2147483647, %v612_v43 }
 0x90c   :  { %v640_v52 = vor.u32 1.1754944e-38, %v639_v50  ;;  %vm638_vm13 = vcmp.eq.f32.partialorder %v637_v49, 8.507059e+37 }
 0x910   :  { %v1330_v44 = vpop.eup %1329 }
 0x911   :  { %v629_v45 = vmul.f32 %v1330_v44, %v612_v43  ;;  %vm634_vm9 = vweird.f32 %v1330_v44  ;;  %v166_v43 = vadd.f32 %v1724_v14, %v1623_v33 }
 0x912   :  { %vm635_vm12 = vmor %vm633_vm11, %vm634_vm9 }
 0x913   :  { %v630_v46 = vsub.f32 1.0, %v629_v45 }
 0x915   :  { %v631_v47 = vmul.f32 %v1330_v44, %v630_v46 }
 0x917   :  { %v632_v48 = vadd.f32 %v1330_v44, %v631_v47 }
 0x919   :  { %v636_v51 = vsel %vm635_vm12, %v1330_v44, %v632_v48  ;;  %v137_v44 = vadd.f32 %v1722_v3, %v1627_v42 }
 0x91a   :  { %v641_v53 = vsel %vm638_vm13, %v640_v52, %v636_v51 }
 0x979   :  { %v658_v54 = vpop.permute.xlu0 %657 }
 0x97a   :  { %v660_v56 = vmul.f32 %v658_v54, %v641_v53 }
 0x97c   :  { %v661_v57 = vpack.c.bf16 %v660_v56, %v660_v56 }
 0x97e   :  { %1218 = vmatmul.msk.bf16.vlgmr.msra.gmra.mxu2 %vm215_vm10, %v661_v57  ;;  %1219 = vmatmul.msk.bf16.vlgmr.msra.gmra.mxu3 %vm215_vm10, %v661_v57 }
 0xa01   :  { %v674_v55 = vpop.f32.mrf.mxu2  ;;  %v687_v60 = vpop.f32.mrf.mxu3 }
 0xa02   :  { %v691_v61 = vadd.f32 %v674_v55, %v134_v59  ;;  %v692_v63 = vadd.f32 %v687_v60, %v163_v58 }
 0xa04   :  { %1331 = vtanh.f32 %v692_v63  ;;  %v1220_v2 = vmul.f32 -1.442695, %v691_v61  ;;  %v1221_v21 = vmul.f32 -1.442695, %v692_v63 }
 0xa06   :  { %1333 = vpow2.f32 %v1220_v2 }
 0xa09   :  { %v676_v0 = vpop.f32.mrf.mxu2  ;;  %v689_v1 = vpop.f32.mrf.mxu3 }
 0xa0a   :  { %v1332_v62 = vpop.eup %1331 }
 0xa0b   :  { %734 = vrot.lane.b32.xlu1 %v1332_v62, %s1489_s22 }
 0xa0c   :  { %v1334_v5 = vpop.eup %1333 }
 0xa0d   :  { %v699_v4 = vadd.f32 1.0, %v1334_v5 }
 0xa0f   :  { %1335 = vrcp.f32 %v699_v4  ;;  %v712_v30 = vand.u32 2147483648, %v699_v4  ;;  %vm706_vm15 = vweird.f32 %v699_v4  ;;  %v710_v9 = vand.u32 2147483647, %v699_v4 }
 0xa11   :  { %v713_v11 = vor.u32 1.1754944e-38, %v712_v30  ;;  %vm711_vm0 = vcmp.eq.f32.partialorder %v710_v9, 8.507059e+37 }
 0xa15   :  { %v1336_v19 = vpop.eup %1335 }
 0xa16   :  { %v702_v7 = vmul.f32 %v1336_v19, %v699_v4  ;;  %vm707_vm14 = vweird.f32 %v1336_v19 }
 0xa17   :  { %vm708_vm1 = vmor %vm706_vm15, %vm707_vm14 }
 0xa18   :  { %v703_v26 = vsub.f32 1.0, %v702_v7 }
 0xa1a   :  { %v704_v27 = vmul.f32 %v1336_v19, %v703_v26 }
 0xa1c   :  { %v705_v6 = vadd.f32 %v1336_v19, %v704_v27 }
 0xa1e   :  { %v709_v10 = vsel %vm708_vm1, %v1336_v19, %v705_v6 }
 0xa1f   :  { %v714_v12 = vsel %vm711_vm0, %v713_v11, %v709_v10 }
 0xa20   :  { %v732_v16 = vmul.f32 %v714_v12, %v654_v38 }
 0xa7d   :  { %v735_v13 = vpop.permute.xlu1 %734 }
 0xa7e   :  { %v737_v15 = vmul.f32 %v735_v13, %v714_v12 }
 0xa80   :  { %739 = vrot.lane.b32.xlu2 %v737_v15, %s1489_s22 }
 0xada   :  { %v740_v17 = vpop.permute.xlu2 %739 }
 0xadb   :  { %v742_v18 = vadd.f32 %v740_v17, %v732_v16 }
 0xadd   :  { %1337 = vtanh.f32 %v742_v18 }
 0xade   :  { %1339 = vpow2.f32 %v1221_v21  ;;  %v1758_v21 = vadd.f32 %v1728_v23, %v1623_v33 }
 0xae3   :  { %v1338_v20 = vpop.eup %1337 }
 0xae4   :  { %745 = vrot.lane.b32.xlu0 %v1338_v20, %s1489_s22  ;;  %v1340_v22 = vpop.eup %1339 }
 0xae5   :  { %v700_v24 = vadd.f32 1.0, %v1340_v22 }
 0xae7   :  { %1341 = vrcp.f32 %v700_v24  ;;  %v727_v34 = vand.u32 2147483648, %v700_v24  ;;  %vm721_vm3 = vweird.f32 %v700_v24  ;;  %v725_v35 = vand.u32 2147483647, %v700_v24 }
 0xae9   :  { %v728_v37 = vor.u32 1.1754944e-38, %v727_v34  ;;  %vm726_vm5 = vcmp.eq.f32.partialorder %v725_v35, 8.507059e+37 }
 0xaed   :  { %v1342_v25 = vpop.eup %1341 }
 0xaee   :  { %v717_v28 = vmul.f32 %v1342_v25, %v700_v24  ;;  %vm722_vm2 = vweird.f32 %v1342_v25 }
 0xaef   :  { %vm723_vm4 = vmor %vm721_vm3, %vm722_vm2 }
 0xaf0   :  { %v718_v29 = vsub.f32 1.0, %v717_v28 }
 0xaf2   :  { %v719_v31 = vmul.f32 %v1342_v25, %v718_v29 }
 0xaf4   :  { %v720_v32 = vadd.f32 %v1342_v25, %v719_v31 }
 0xaf6   :  { %v724_v36 = vsel %vm723_vm4, %v1342_v25, %v720_v32  ;;  %v1764_v32 = vadd.f32 %v1726_v8, %v1627_v42 }
 0xaf7   :  { %v729_v39 = vsel %vm726_vm5, %v728_v37, %v724_v36 }
 0xb56   :  { %v746_v38 = vpop.permute.xlu0 %745 }
 0xb57   :  { %v748_v40 = vmul.f32 %v746_v38, %v729_v39 }
 0xb59   :  { %v749_v41 = vpack.c.bf16 %v748_v40, %v748_v40 }
 0xb5b   :  { %1222 = vmatmul.msk.bf16.vlgmr.msra.gmra.mxu0 %vm215_vm10, %v749_v41  ;;  %1223 = vmatmul.msk.bf16.vlgmr.msra.gmra.mxu1 %vm215_vm10, %v749_v41 }
 0xbd8   :  { %v762_v45 = vpop.f32.mrf.mxu0  ;;  %v775_v46 = vpop.f32.mrf.mxu1 }
 0xbd9   :  { %v779_v47 = vadd.f32 %v762_v45, %v137_v44  ;;  %v780_v48 = vadd.f32 %v775_v46, %v166_v43 }
 0xbdb   :  { %1343 = vtanh.f32 %v780_v48  ;;  %v1224_v52 = vmul.f32 -1.442695, %v779_v47  ;;  %v1225_v19 = vmul.f32 -1.442695, %v780_v48 }
 0xbdd   :  { %1345 = vpow2.f32 %v1224_v52 }
 0xbe0   :  { %v764_v50 = vpop.f32.mrf.mxu0  ;;  %v777_v49 = vpop.f32.mrf.mxu1 }
 0xbe1   :  { %v1344_v51 = vpop.eup %1343 }
 0xbe2   :  { %822 = vrot.lane.b32.xlu1 %v1344_v51, %s1489_s22 }
 0xbe3   :  { %v1346_v53 = vpop.eup %1345 }
 0xbe4   :  { %v787_v54 = vadd.f32 1.0, %v1346_v53 }
 0xbe6   :  { %1347 = vrcp.f32 %v787_v54  ;;  %v800_v59 = vand.u32 2147483648, %v787_v54  ;;  %vm794_vm7 = vweird.f32 %v787_v54  ;;  %v798_v55 = vand.u32 2147483647, %v787_v54 }
 0xbe8   :  { %v801_v61 = vor.u32 1.1754944e-38, %v800_v59  ;;  %vm799_vm9 = vcmp.eq.f32.partialorder %v798_v55, 8.507059e+37 }
 0xbec   :  { %v1348_v56 = vpop.eup %1347 }
 0xbed   :  { %v790_v14 = vmul.f32 %v1348_v56, %v787_v54  ;;  %vm795_vm6 = vweird.f32 %v1348_v56 }
 0xbee   :  { %vm796_vm8 = vmor %vm794_vm7, %vm795_vm6  ;;  %vm925_vm7 = vcmask 261120  }
 0xbef   :  { %v791_v57 = vsub.f32 1.0, %v790_v14 }
 0xbf1   :  { %v792_v58 = vmul.f32 %v1348_v56, %v791_v57 }
 0xbf3   :  { %v793_v3 = vadd.f32 %v1348_v56, %v792_v58 }
 0xbf5   :  { %v797_v60 = vsel %vm796_vm8, %v1348_v56, %v793_v3 }
 0xbf6   :  { %v802_v0 = vsel %vm799_vm9, %v801_v61, %v797_v60 }
 0xbf7   :  { %v820_v62 = vmul.f32 %v802_v0, %v742_v18 }
 0xc54   :  { %v823_v63 = vpop.permute.xlu1 %822 }
 0xc55   :  { %v825_v1 = vmul.f32 %v823_v63, %v802_v0 }
 0xc57   :  { %827 = vrot.lane.b32.xlu2 %v825_v1, %s1489_s22 }
 0xcb1   :  { %v828_v2 = vpop.permute.xlu2 %827 }
 0xcb2   :  { %v830_v5 = vadd.f32 %v828_v2, %v820_v62 }
 0xcb4   :  { %1349 = vtanh.f32 %v830_v5 }
 0xcb5   :  { %1351 = vpow2.f32 %v1225_v19 }
 0xcba   :  { %v1350_v4 = vpop.eup %1349 }
 0xcbb   :  { %833 = vrot.lane.b32.xlu0 %v1350_v4, %s1489_s22  ;;  %v1352_v7 = vpop.eup %1351 }
 0xcbc   :  { %v788_v26 = vadd.f32 1.0, %v1352_v7 }
 0xcbe   :  { %1353 = vrcp.f32 %v788_v26  ;;  %v815_v11 = vand.u32 2147483648, %v788_v26  ;;  %vm809_vm12 = vweird.f32 %v788_v26  ;;  %v813_v12 = vand.u32 2147483647, %v788_v26 }
 0xcc0   :  { %v816_v15 = vor.u32 1.1754944e-38, %v815_v11  ;;  %vm814_vm14 = vcmp.eq.f32.partialorder %v813_v12, 8.507059e+37 }
 0xcc4   :  { %v1354_v27 = vpop.eup %1353 }
 0xcc5   :  { %v805_v6 = vmul.f32 %v1354_v27, %v788_v26  ;;  %vm810_vm11 = vweird.f32 %v1354_v27 }
 0xcc6   :  { %vm811_vm13 = vmor %vm809_vm12, %vm810_vm11 }
 0xcc7   :  { %v806_v30 = vsub.f32 1.0, %v805_v6 }
 0xcc9   :  { %v807_v9 = vmul.f32 %v1354_v27, %v806_v30 }
 0xccb   :  { %v808_v10 = vadd.f32 %v1354_v27, %v807_v9 }
 0xccd   :  { %v812_v13 = vsel %vm811_vm13, %v1354_v27, %v808_v10 }
 0xcce   :  { %v817_v16 = vsel %vm814_vm14, %v816_v15, %v812_v13 }
 0xd2d   :  { %v834_v17 = vpop.permute.xlu0 %833 }
 0xd2e   :  { %v836_v18 = vmul.f32 %v834_v17, %v817_v16 }
 0xd30   :  { %v837_v20 = vpack.c.bf16 %v836_v18, %v836_v18 }
 0xd32   :  { %1226 = vmatmul.msk.bf16.vlgmr.msrb.gmra.mxu2 %vm215_vm10, %v837_v20  ;;  %1227 = vmatmul.msk.bf16.vlgmr.msrb.gmra.mxu3 %vm215_vm10, %v837_v20 }
 0xdb5   :  { %v850_v22 = vpop.f32.mrf.mxu2  ;;  %v863_v24 = vpop.f32.mrf.mxu3 }
 0xdb6   :  { %v868_v25 = vadd.f32 %v863_v24, %v1758_v21  ;;  %v867_v34 = vadd.f32 %v850_v22, %v1764_v32 }
 0xdb8   :  { %1355 = vtanh.f32 %v868_v25  ;;  %v1228_v35 = vmul.f32 -1.442695, %v867_v34  ;;  %v1229_v51 = vmul.f32 -1.442695, %v868_v25 }
 0xdba   :  { %1357 = vpow2.f32 %v1228_v35 }
 0xdbd   :  { %v852_v28 = vpop.f32.mrf.mxu2  ;;  %v865_v29 = vpop.f32.mrf.mxu3 }
 0xdbe   :  { %v1356_v31 = vpop.eup %1355 }
 0xdbf   :  { %910 = vrot.lane.b32.xlu1 %v1356_v31, %s1489_s22 }
 0xdc0   :  { %v1358_v33 = vpop.eup %1357 }
 0xdc1   :  { %v875_v23 = vadd.f32 1.0, %v1358_v33 }
 0xdc3   :  { %1359 = vrcp.f32 %v875_v23  ;;  %v888_v41 = vand.u32 2147483648, %v875_v23  ;;  %vm882_vm1 = vweird.f32 %v875_v23  ;;  %v886_v43 = vand.u32 2147483647, %v875_v23 }
 0xdc5   :  { %v889_v42 = vor.u32 1.1754944e-38, %v888_v41  ;;  %vm887_vm2 = vcmp.eq.f32.partialorder %v886_v43, 8.507059e+37  ;;  %v1258_v41 = vld [vmem:[%s1815_s4 + $0x8] sm:$0xff] }
 0xdc6   :  { %1065 = vmatpush.bf16.msra.mxu2 %v1258_v41 }
 0xdc9   :  { %v1360_v36 = vpop.eup %1359 }
 0xdca   :  { %v878_v37 = vmul.f32 %v1360_v36, %v875_v23  ;;  %vm883_vm15 = vweird.f32 %v1360_v36 }
 0xdcb   :  { %vm884_vm0 = vmor %vm882_vm1, %vm883_vm15 }
 0xdcc   :  { %v879_v38 = vsub.f32 1.0, %v878_v37 }
 0xdce   :  { %v880_v39 = vmul.f32 %v1360_v36, %v879_v38 }
 0xdd0   :  { %v881_v40 = vadd.f32 %v1360_v36, %v880_v39 }
 0xdd2   :  { %v885_v44 = vsel %vm884_vm0, %v1360_v36, %v881_v40 }
 0xdd3   :  { %v890_v8 = vsel %vm887_vm2, %v889_v42, %v885_v44  ;;  %v1257_v44 = vld [vmem:[%s1815_s4] sm:$0xff] }
 0xdd4   :  { %v908_v47 = vmul.f32 %v890_v8, %v830_v5  ;;  %1066 = vmatpush.bf16.msra.mxu2 %v1257_v44 }
 0xe31   :  { %v911_v45 = vpop.permute.xlu1 %910 }
 0xe32   :  { %v913_v46 = vmul.f32 %v911_v45, %v890_v8 }
 0xe34   :  { %915 = vrot.lane.b32.xlu2 %v913_v46, %s1489_s22 }
 0xe8e   :  { %v916_v48 = vpop.permute.xlu2 %915 }
 0xe8f   :  { %v1768_v50 = vadd.f32 %v916_v48, %v908_v47 }
 0xe91   :  { %1361 = vtanh.f32 %v1768_v50 }
 0xe92   :  { %1363 = vpow2.f32 %v1229_v51 }
 0xe97   :  { %v1362_v49 = vpop.eup %1361 }
 0xe98   :  { %921 = vrot.lane.b32.xlu0 %v1362_v49, %s1489_s22  ;;  %v1364_v52 = vpop.eup %1363 }
 0xe99   :  { %v876_v53 = vadd.f32 1.0, %v1364_v52  ;;  %v1270_v52 = vld [vmem:[%s1816_s5] ss:$0 sm:$0xff]  ;;  %s1494_s5 = smov [#allocation8]  }
 0xe9a   :  { %s1111_s18 = sshll.u32 %s1494_s5, 4  ;;  %s1112_s18 = int_to_ptr.vmem [resolvable:$true] %s1111_s18 }
 0xe9b   :  { %1365 = vrcp.f32 %v876_v53  ;;  %v903_v3 = vand.u32 2147483648, %v876_v53  ;;  %vm897_vm4 = vweird.f32 %v876_v53  ;;  %v901_v59 = vand.u32 2147483647, %v876_v53 }
 0xe9d   :  { %v904_v60 = vor.u32 1.1754944e-38, %v903_v3  ;;  %vm902_vm6 = vcmp.eq.f32.partialorder %v901_v59, 8.507059e+37 }
 0xea1   :  { %v1366_v54 = vpop.eup %1365 }
 0xea2   :  { %v893_v56 = vmul.f32 %v1366_v54, %v876_v53  ;;  %vm898_vm3 = vweird.f32 %v1366_v54 }
 0xea3   :  { %vm899_vm5 = vmor %vm897_vm4, %vm898_vm3 }
 0xea4   :  { %v894_v14 = vsub.f32 1.0, %v893_v56 }
 0xea6   :  { %v895_v57 = vmul.f32 %v1366_v54, %v894_v14 }
 0xea8   :  { %v896_v58 = vadd.f32 %v1366_v54, %v895_v57 }
 0xeaa   :  { %v900_v55 = vsel %vm899_vm5, %v1366_v54, %v896_v58 }
 0xeab   :  { %v905_v63 = vsel %vm902_vm6, %v904_v60, %v900_v55 }
 0xf0a   :  { %v922_v61 = vpop.permute.xlu0 %921 }
 0xf0b   :  { %v924_v0 = vmul.f32 %v922_v61, %v905_v63 }
 0xf0d   :  { %926 = vst.msk [vmem:[#allocation6] sm:$0xff] %vm925_vm7, %v924_v0  ;;  %v932_v1 = vpack.c.bf16 %v924_v0, %v924_v0 }
 0xf0f   :  { %1230 = vmatmul.msk.bf16.vlgmr.msrb.gmra.mxu0 %vm215_vm10, %v932_v1  ;;  %1231 = vmatmul.msk.bf16.vlgmr.msrb.gmra.mxu1 %vm215_vm10, %v932_v1 }
 0xf8c   :  { %v945_v62 = vpop.f32.mrf.mxu0  ;;  %v958_v2 = vpop.f32.mrf.mxu1 }
 0xf8d   :  { %v963_v5 = vadd.f32 %v958_v2, %v1758_v21  ;;  %v962_v26 = vadd.f32 %v945_v62, %v1764_v32 }
 0xf8f   :  { %1367 = vtanh.f32 %v963_v5  ;;  %v1232_v27 = vmul.f32 -1.442695, %v962_v26  ;;  %v1233_v31 = vmul.f32 -1.442695, %v963_v5 }
 0xf91   :  { %1369 = vpow2.f32 %v1232_v27 }
 0xf94   :  { %v947_v4 = vpop.f32.mrf.mxu0  ;;  %v960_v19 = vpop.f32.mrf.mxu1 }
 0xf95   :  { %v1368_v7 = vpop.eup %1367 }
 0xf96   :  { %1005 = vrot.lane.b32.xlu1 %v1368_v7, %s1489_s22 }
 0xf97   :  { %v1370_v6 = vpop.eup %1369 }
 0xf98   :  { %v970_v30 = vadd.f32 1.0, %v1370_v6 }
 0xf9a   :  { %1371 = vrcp.f32 %v970_v30  ;;  %v983_v15 = vand.u32 2147483648, %v970_v30  ;;  %vm977_vm8 = vweird.f32 %v970_v30  ;;  %v981_v16 = vand.u32 2147483647, %v970_v30 }
 0xf9c   :  { %v984_v18 = vor.u32 1.1754944e-38, %v983_v15  ;;  %vm982_vm11 = vcmp.eq.f32.partialorder %v981_v16, 8.507059e+37 }
 0xfa0   :  { %v1372_v9 = vpop.eup %1371 }
 0xfa1   :  { %v973_v10 = vmul.f32 %v1372_v9, %v970_v30  ;;  %vm978_vm10 = vweird.f32 %v1372_v9 }
 0xfa2   :  { %vm979_vm9 = vmor %vm977_vm8, %vm978_vm10 }
 0xfa3   :  { %v974_v11 = vsub.f32 1.0, %v973_v10 }
 0xfa5   :  { %v975_v12 = vmul.f32 %v1372_v9, %v974_v11 }
 0xfa7   :  { %v976_v13 = vadd.f32 %v1372_v9, %v975_v12 }
 0xfa9   :  { %v980_v17 = vsel %vm979_vm9, %v1372_v9, %v976_v13 }
 0xfaa   :  { %v985_v21 = vsel %vm982_vm11, %v984_v18, %v980_v17 }
 0xfab   :  { %v1003_v24 = vmul.f32 %v985_v21, %v1768_v50 }
0x1008   :  { %v1006_v20 = vpop.permute.xlu1 %1005 }
0x1009   :  { %v1008_v22 = vmul.f32 %v1006_v20, %v985_v21 }
0x100b   :  { %1010 = vrot.lane.b32.xlu2 %v1008_v22, %s1489_s22 }
0x1065   :  { %v1011_v25 = vpop.permute.xlu2 %1010 }
0x1066   :  { %v1013_v28 = vadd.f32 %v1011_v25, %v1003_v24 }
0x1068   :  { %1373 = vtanh.f32 %v1013_v28 }
0x1069   :  { %1375 = vpow2.f32 %v1233_v31 }
0x106e   :  { %v1374_v29 = vpop.eup %1373 }
0x106f   :  { %1016 = vrot.lane.b32.xlu0 %v1374_v29, %s1489_s22  ;;  %v1376_v32 = vpop.eup %1375 }
0x1070   :  { %v971_v34 = vadd.f32 1.0, %v1376_v32 }
0x1072   :  { %1377 = vrcp.f32 %v971_v34  ;;  %v998_v38 = vand.u32 2147483648, %v971_v34  ;;  %vm992_vm13 = vweird.f32 %v971_v34  ;;  %v996_v39 = vand.u32 2147483647, %v971_v34 }
0x1074   :  { %v999_v43 = vor.u32 1.1754944e-38, %v998_v38  ;;  %vm997_vm15 = vcmp.eq.f32.partialorder %v996_v39, 8.507059e+37 }
0x1078   :  { %v1378_v35 = vpop.eup %1377 }
0x1079   :  { %v988_v33 = vmul.f32 %v1378_v35, %v971_v34  ;;  %vm993_vm12 = vweird.f32 %v1378_v35 }
0x107a   :  { %vm994_vm14 = vmor %vm992_vm13, %vm993_vm12 }
0x107b   :  { %v989_v23 = vsub.f32 1.0, %v988_v33 }
0x107d   :  { %v990_v36 = vmul.f32 %v1378_v35, %v989_v23 }
0x107f   :  { %v991_v37 = vadd.f32 %v1378_v35, %v990_v36 }
0x1081   :  { %v995_v40 = vsel %vm994_vm14, %v1378_v35, %v991_v37 }
0x1082   :  { %v1000_v42 = vsel %vm997_vm15, %v999_v43, %v995_v40 }
0x10e1   :  { %v1017_v8 = vpop.permute.xlu0 %1016 }
0x10e2   :  { %v1019_v45 = vmul.f32 %v1017_v8, %v1000_v42 }
0x10e4   :  { %v1032_v46 = vpack.c.bf16 %v1019_v45, %v1019_v45 }
0x10e6   :  { %1042 = vrot.lane.b32.xlu1 %v1032_v46, %s1491_s9 }
0x10ee   :  { %1021 = vrot.lane.b32.xlu1 %v1019_v45, %s1491_s9 }
0x10f6   :  { %928 = vrot.lane.b32.xlu1 %v1768_v50, %s1489_s22 }
0x10fe   :  { %1027 = vrot.lane.b32.xlu1 %v1013_v28, %s1492_s12 }
0x1158   :  { %v1043_v47 = vpop.permute.xlu1 %1042 }
0x1159   :  { %1242 = vmatmul.msk.bf16.vlgmr.msra.gmra.mxu2 %vm925_vm7, %v1043_v47 }
0x1160   :  { %v1022_v48 = vpop.permute.xlu1 %1021 }
0x1161   :  { %1025 = vst.msk [vmem:[#allocation6 + $0x8] sm:$0xff] %vm925_vm7, %v1022_v48 }
0x1162   :  { %1106 = dma.vmem_to_hbm [thread:$0]  %s1099_s14, 256, %s1101_s17, [#allocation7], %s1486_s10, %s1486_s10, %s1487_s11  }
0x1168   :  { %v929_v49 = vpop.permute.xlu1 %928 }
0x1169   :  { %931 = vst.msk [vmem:[#allocation8] sm:$0xff] %vm925_vm7, %v929_v49 }
0x1170   :  { %v1028_v51 = vpop.permute.xlu1 %1027 }
0x1171   :  { %1031 = vst.msk [vmem:[#allocation8 + $0x8] sm:$0xff] %vm925_vm7, %v1028_v51 }
0x1172   :  { %1119 = dma.vmem_to_hbm [thread:$0]  %s1112_s18, 256, %s1114_s1, [#allocation7], %s1486_s10, %s1486_s10, %s1487_s11  }
0x11dc   :  { %v1068_v53 = vpop.f32.mrf.mxu2 }
0x11dd   :  { %v1069_v50 = vadd.f32 %v1270_v52, %v1068_v53 }
0x11df   :  { %1072 = vmax.xlane.f32.xlu2 %v1069_v50 }
0x11e4   :  { %v1070_v54 = vpop.f32.mrf.mxu2 }
0x1252   :  { %v1073_v56 = vpop.xlane.xlu2 %1072 }
0x1253   :  { %v1074_v14 = vsub.f32 %v1069_v50, %v1073_v56 }
0x1255   :  { %v1075_v57 = vmul.f32 1.442695, %v1074_v14 }
0x1257   :  { %1379 = vpow2.f32 %v1075_v57 }
0x125d   :  { %v1380_v58 = vpop.eup %1379 }
0x125e   :  { %1077 = vadd.xlane.f32.xlu0 %v1380_v58 }
0x12d1   :  { %v1078_v3 = vpop.xlane.xlu0 %1077 }
0x12d2   :  { %1381 = vlog2.f32 %v1078_v3 }
0x12d8   :  { %v1382_v59 = vpop.eup %1381 }
0x12d9   :  { %v1080_v55 = vmul.f32 0.6931472, %v1382_v59 }
0x12db   :  { %v1081_v60 = vsub.f32 %v1074_v14, %v1080_v55 }
0x12dd   :  { %1082 = vst [vmem:[#allocation5] sm:$0xff] %v1081_v60 }
0x12de   :  { %1093 = dma.vmem_to_hbm [thread:$0]  %s1089_s21, 128, %s1091_s23, [#allocation4]  }
0x12df   :  { %1481 = dma.done.wait [#allocation4], 128  }
0x12e0   :  { %1482 = vsyncadd [#allocation4], 4294967168 }
0x12e1   :  { %1483 = dma.done.wait [#allocation7], 512  }
0x12e2   :  { %1484 = vsyncadd [#allocation7], 4294966784 }
0x12e3   :  { %1132 = vsyncpa [#allocation3], 1 }
0x12e4   :  { %1133 = vsyncpa [#allocation4], 1 }
0x12e5   :  { %1134 = vsyncpa [#allocation7], 1 }

</bundles_post_ra>
